<compile_context>
chip_gen: v7x
topology: tpu7x:2x2x1
jax: 0.10.0
libtpu: 0.0.40
codegen_flags: <defaults>
</compile_context>

<pallas_src>
import functools
import math

import jax
import jax.numpy as jnp
from jax.experimental import pallas as pl
from jax.experimental.pallas import tpu as pltpu


# ---------------------------------------------------------------------------
# Fused kernel: LayerNorm + (kxk, stride-s) conv via im2col + one MXU matmul
# ---------------------------------------------------------------------------
def _sentence_agg_kernel(x_ref, w_ref, gamma_ref, beta_ref, bias_ref, o_ref,
                         xp_ref, patch_ref, *, s, c_in, eps):
    Bt, H, W_out, SC = x_ref.shape            # SC = s * c_in (lane-folded columns)
    C = c_in
    H_out = H // s
    QH = H_out + 1                            # +1 row-block of top padding
    QW = W_out + 1                            # +1 column of left padding
    k = 2 * s - 1
    M = Bt * H_out * W_out
    c_out = o_ref.shape[-1]

    # ---- LayerNorm over each pixel's own C channels (lane segments of size C) ----
    x = x_ref[...].astype(jnp.float32)                          # (Bt, H, W/s, s*C)
    lane = jax.lax.broadcasted_iota(jnp.int32, (1, 1, 1, SC), 3)
    inv_c = 1.0 / C
    mean = jnp.zeros_like(x)
    for p in range(s):                                          # s small, static
        m = (lane >= p * C) & (lane < (p + 1) * C)
        mu = jnp.sum(jnp.where(m, x, 0.0), axis=-1, keepdims=True) * inv_c
        mean = jnp.where(m, mu, mean)
    xc = x - mean
    var = jnp.zeros_like(x)
    for p in range(s):
        m = (lane >= p * C) & (lane < (p + 1) * C)
        v = jnp.sum(jnp.where(m, xc * xc, 0.0), axis=-1, keepdims=True) * inv_c
        var = jnp.where(m, v, var)
    xn = xc * jax.lax.rsqrt(var + eps) * gamma_ref[...] + beta_ref[...]

    # ---- scatter xn into the zero-padded, phase-folded scratch ----
    # xp[b, qh, rh, u, p*C + c] = xn at pixel (h=(qh-1)*s+rh, w=(u-1)*s+p), channel c
    xp_ref[:, 0:1, :, :, :] = jnp.zeros((Bt, 1, s, QW, SC), xp_ref.dtype)   # top pad
    xp_ref[:, :, :, 0:1, :] = jnp.zeros((Bt, QH, s, 1, SC), xp_ref.dtype)   # left pad
    xp_ref[:, 1:, :, 1:, :] = xn.reshape(Bt, H_out, s, W_out, SC)

    # ---- im2col: each of the k*k taps is a static slice of the scratch ----
    # conv input (h, w) = (oh*s + di - pad, ow*s + dj - pad); with the +s origin
    # shift used above, tap (di, dj) reads (qh=oh+qi, rh=ri, u=ow+qj, phase rj)
    # where (qi, ri) = divmod(di+1, s), (qj, rj) = divmod(dj+1, s).
    for t in range(k * k):
        di, dj = t // k, t % k
        qi, ri = divmod(di + 1, s)
        qj, rj = divmod(dj + 1, s)
        tap = xp_ref[:, qi:qi + H_out, ri, qj:qj + W_out, rj * C:(rj + 1) * C]
        patch_ref[:, t * C:(t + 1) * C] = tap.reshape(M, C).astype(patch_ref.dtype)

    # ---- one big matmul: (Bt*M_out, k*k*C) @ (k*k*C, C_out), f32 accumulation ----
    acc = jnp.dot(patch_ref[...], w_ref[...], preferred_element_type=jnp.float32)
    out = acc + bias_ref[...]
    o_ref[...] = out.reshape(Bt, H_out * W_out, c_out).astype(o_ref.dtype)


# ---------------------------------------------------------------------------
# Module forward (single fused pallas_call)
# ---------------------------------------------------------------------------
def sentence_aggregation(x, params, H, W, stride=2, eps=1e-5, batch_tile=None):
    B, N, C = x.shape
    assert N == H * W
    s = stride
    # TODO(synk): ceil-mode (H or W not divisible by stride) needs an extra
    #             right/bottom zero-pad path; not required for the test shapes.
    assert H % s == 0 and W % s == 0, "fused kernel requires H, W divisible by stride"
    k = 2 * s - 1
    H_out, W_out = H // s, W // s
    M_out = H_out * W_out
    C_out = params["w_conv"].shape[0]
    SC = s * C

    if batch_tile is None:
        # Fold batch into the matmul M dimension.  For large B, pick batch_tile so
        # the resulting grid stays a multiple of the TensorCore count.
        batch_tile = 2 if B % 2 == 0 else 1
    Bt = batch_tile
    assert B % Bt == 0

    # Free (contiguous) reshape: column phase folded into the lane dim.
    x_f = x.reshape(B, H, W_out, SC)
    # Pre-concatenated conv weights (k*k*C_in, C_out) in bf16; in a real model this
    # would be precomputed once alongside the parameters.
    w_cat = (jnp.transpose(params["w_conv"], (2, 3, 1, 0))
             .reshape(k * k * C, C_out).astype(jnp.bfloat16))
    gamma_f = jnp.tile(params["gamma"].astype(jnp.float32), s).reshape(1, SC)
    beta_f = jnp.tile(params["beta"].astype(jnp.float32), s).reshape(1, SC)
    bias = params["b_conv"].astype(jnp.float32).reshape(1, C_out)

    kern = functools.partial(_sentence_agg_kernel, s=s, c_in=C, eps=eps)
    out = pl.pallas_call(
        kern,
        out_shape=jax.ShapeDtypeStruct((B, M_out, C_out), x.dtype),
        grid=(B // Bt,),
        in_specs=[
            pl.BlockSpec((Bt, H, W_out, SC), lambda b: (b, 0, 0, 0)),   # x (folded)
            pl.BlockSpec((k * k * C, C_out), lambda b: (0, 0)),         # conv weights
            pl.BlockSpec((1, SC), lambda b: (0, 0)),                    # LN gamma (tiled)
            pl.BlockSpec((1, SC), lambda b: (0, 0)),                    # LN beta (tiled)
            pl.BlockSpec((1, C_out), lambda b: (0, 0)),                 # conv bias
        ],
        out_specs=pl.BlockSpec((Bt, M_out, C_out), lambda b: (b, 0, 0)),
        scratch_shapes=[
            # zero-padded, phase-folded LN output (f32: LN math stays f32)
            pltpu.VMEM((Bt, H_out + 1, s, W_out + 1, SC), jnp.float32),
            # im2col patch, bf16 MXU operand
            pltpu.VMEM((Bt * M_out, k * k * C), jnp.bfloat16),
        ],
        compiler_params=pltpu.CompilerParams(
            dimension_semantics=("parallel",)),
    )(x_f, w_cat, gamma_f, beta_f, bias)
    return out, H_out, W_out


# ---------------------------------------------------------------------------
# Deterministic parameter init (PyTorch-style bounds; affine LN exercised)
# ---------------------------------------------------------------------------
def init_params(key, c_in, c_out, stride):
    ksize = 2 * stride - 1
    k1, k2, k3, k4 = jax.random.split(key, 4)
    bound = 1.0 / math.sqrt(c_in * ksize * ksize)
    return {
        "gamma": 1.0 + 0.1 * jax.random.normal(k1, (c_in,), jnp.float32),
        "beta": 0.1 * jax.random.normal(k2, (c_in,), jnp.float32),
        "w_conv": jax.random.uniform(k3, (c_out, c_in, ksize, ksize),
                                     jnp.float32, -bound, bound),
        "b_conv": jax.random.uniform(k4, (c_out,), jnp.float32, -bound, bound),
    }


# ---------------------------------------------------------------------------
# Pure-JAX reference (mirrors the PyTorch module exactly)
# ---------------------------------------------------------------------------
def sentence_aggregation_ref(params, x, H, W, stride=2, eps=1e-5,
                             round_matmul_inputs=False):
    B, N, C = x.shape
    mean = x.mean(-1, keepdims=True)
    var = ((x - mean) ** 2).mean(-1, keepdims=True)
    xn = (x - mean) / jnp.sqrt(var + eps) * params["gamma"] + params["beta"]
    w = params["w_conv"]
    if round_matmul_inputs:   # emulate the kernel's bf16 MXU operands
        xn = xn.astype(jnp.bfloat16).astype(jnp.float32)
        w = w.astype(jnp.bfloat16).astype(jnp.float32)
    img = xn.reshape(B, H, W, C).transpose(0, 3, 1, 2)                    # (B, C, H, W)
    pad = stride - 1
    out = jax.lax.conv_general_dilated(
        img, w, window_strides=(stride, stride),
        padding=[(pad, pad), (pad, pad)],
        dimension_numbers=("NCHW", "OIHW", "NCHW"),
        precision=jax.lax.Precision.HIGHEST)
    out = out + params["b_conv"][None, :, None, None]
    H2 = -(-H // stride)
    W2 = -(-W // stride)
    out = out.reshape(B, -1, H2 * W2).transpose(0, 2, 1)                  # (B, H2*W2, C_out)
    return out, H2, W2


if __name__ == "__main__":
    B, H, W = 2, 16, 16
    C_in, C_out, stride = 64, 128, 2
    N = H * W

    key = jax.random.PRNGKey(0)
    kx, kp = jax.random.split(key)
    x = jax.random.normal(kx, (B, N, C_in), jnp.float32)
    params = init_params(kp, C_in, C_out, stride)

    out, H2, W2 = sentence_aggregation(x, params, H, W, stride)
    out = jax.block_until_ready(out)

    ref, H2r, W2r = sentence_aggregation_ref(params, x, H, W, stride)
    assert (H2, W2) == (H2r, W2r) == (8, 8)
    assert out.shape == (B, H2 * W2, C_out)
    # vs exact-f32 module semantics (kernel uses bf16 MXU operands -> loose tol)
    assert jnp.allclose(out, ref, atol=5e-2, rtol=5e-2), "mismatch vs f32 reference"
    # vs reference with matmul inputs rounded to bf16 (isolates layout/indexing)
    ref_b, _, _ = sentence_aggregation_ref(params, x, H, W, stride,
                                           round_matmul_inputs=True)
    assert jnp.allclose(out, ref_b, atol=5e-3, rtol=5e-3), \
        "mismatch vs bf16-rounded reference"

    print("KERNEL_OK")
</pallas_src>

<mosaic_0001>
module attributes {stable_mosaic.version = 11 : i64} {
  func.func @_sentence_agg_kernel(%arg0: i32, %arg1: memref<2x16x8x128xf32, #tpu.memory_space<vmem>>, %arg2: memref<576x128xbf16, #tpu.memory_space<vmem>>, %arg3: memref<1x128xf32, #tpu.memory_space<vmem>>, %arg4: memref<1x128xf32, #tpu.memory_space<vmem>>, %arg5: memref<1x128xf32, #tpu.memory_space<vmem>>, %arg6: memref<2x64x128xf32, #tpu.memory_space<vmem>>, %arg7: memref<2x9x2x9x128xf32, #tpu.memory_space<vmem>>, %arg8: memref<128x576xbf16, #tpu.memory_space<vmem>>) attributes {dimension_semantics = [#tpu.dimension_semantics<parallel>], iteration_bounds = array<i64: 1>, scalar_prefetch = 0 : i64, scratch_operands = 2 : i64, tpu.core_type = #tpu.core_type<tc>, window_params = [{transform_indices = @transform_0, window_bounds = array<i64: 2, 16, 8, 128>}, {pipeline_mode = #tpu.pipeline_mode<synchronous>, transform_indices = @transform_1, window_bounds = array<i64: 576, 128>}, {pipeline_mode = #tpu.pipeline_mode<synchronous>, transform_indices = @transform_2, window_bounds = array<i64: 1, 128>}, {pipeline_mode = #tpu.pipeline_mode<synchronous>, transform_indices = @transform_3, window_bounds = array<i64: 1, 128>}, {pipeline_mode = #tpu.pipeline_mode<synchronous>, transform_indices = @transform_4, window_bounds = array<i64: 1, 128>}, {transform_indices = @transform_5, window_bounds = array<i64: 2, 64, 128>}]} {
    %c0 = arith.constant 0 : index
    %c0_0 = arith.constant 0 : index
    %c0_1 = arith.constant 0 : index
    %c0_2 = arith.constant 0 : index
    %0 = vector.load %arg1[%c0, %c0_0, %c0_1, %c0_2] : memref<2x16x8x128xf32, #tpu.memory_space<vmem>>, vector<2x16x8x128xf32>
    %1 = tpu.iota {dimensions = array<i32: 3>} : vector<1x1x1x128xi32>
    %cst = arith.constant 0.000000e+00 : f32
    %2 = vector.broadcast %cst : f32 to vector<2x16x8x128xf32>
    %c0_i32 = arith.constant 0 : i32
    %3 = vector.broadcast %c0_i32 : i32 to vector<1x1x1x128xi32>
    %4 = arith.cmpi sge, %1, %3 : vector<1x1x1x128xi32>
    %c64_i32 = arith.constant 64 : i32
    %5 = vector.broadcast %c64_i32 : i32 to vector<1x1x1x128xi32>
    %6 = arith.cmpi slt, %1, %5 : vector<1x1x1x128xi32>
    %7 = arith.andi %4, %6 : vector<1x1x1x128xi1>
    %cst_3 = arith.constant 0.000000e+00 : f32
    %8 = vector.shape_cast %7 : vector<1x1x1x128xi1> to vector<1x1x1x128xi1>
    %9 = vector.broadcast %8 : vector<1x1x1x128xi1> to vector<2x16x8x128xi1>
    %10 = vector.broadcast %cst_3 : f32 to vector<2x16x8x128xf32>
    %11 = arith.select %9, %0, %10 : vector<2x16x8x128xi1>, vector<2x16x8x128xf32>
    %cst_4 = arith.constant dense<0.000000e+00> : vector<2x16x8xf32>
    %12 = vector.multi_reduction <add>, %11, %cst_4 [3] : vector<2x16x8x128xf32> to vector<2x16x8xf32>
    %13 = vector.shape_cast %12 : vector<2x16x8xf32> to vector<2x16x8x1xf32>
    %cst_5 = arith.constant 1.562500e-02 : f32
    %14 = vector.broadcast %cst_5 : f32 to vector<2x16x8x1xf32>
    %15 = arith.mulf %13, %14 : vector<2x16x8x1xf32>
    %16 = vector.shape_cast %7 : vector<1x1x1x128xi1> to vector<1x1x1x128xi1>
    %17 = vector.broadcast %16 : vector<1x1x1x128xi1> to vector<2x16x8x128xi1>
    %18 = vector.shape_cast %15 : vector<2x16x8x1xf32> to vector<2x16x8x1xf32>
    %19 = vector.broadcast %18 : vector<2x16x8x1xf32> to vector<2x16x8x128xf32>
    %20 = arith.select %17, %19, %2 : vector<2x16x8x128xi1>, vector<2x16x8x128xf32>
    %c64_i32_6 = arith.constant 64 : i32
    %21 = vector.broadcast %c64_i32_6 : i32 to vector<1x1x1x128xi32>
    %22 = arith.cmpi sge, %1, %21 : vector<1x1x1x128xi32>
    %c128_i32 = arith.constant 128 : i32
    %23 = vector.broadcast %c128_i32 : i32 to vector<1x1x1x128xi32>
    %24 = arith.cmpi slt, %1, %23 : vector<1x1x1x128xi32>
    %25 = arith.andi %22, %24 : vector<1x1x1x128xi1>
    %cst_7 = arith.constant 0.000000e+00 : f32
    %26 = vector.shape_cast %25 : vector<1x1x1x128xi1> to vector<1x1x1x128xi1>
    %27 = vector.broadcast %26 : vector<1x1x1x128xi1> to vector<2x16x8x128xi1>
    %28 = vector.broadcast %cst_7 : f32 to vector<2x16x8x128xf32>
    %29 = arith.select %27, %0, %28 : vector<2x16x8x128xi1>, vector<2x16x8x128xf32>
    %cst_8 = arith.constant dense<0.000000e+00> : vector<2x16x8xf32>
    %30 = vector.multi_reduction <add>, %29, %cst_8 [3] : vector<2x16x8x128xf32> to vector<2x16x8xf32>
    %31 = vector.shape_cast %30 : vector<2x16x8xf32> to vector<2x16x8x1xf32>
    %cst_9 = arith.constant 1.562500e-02 : f32
    %32 = vector.broadcast %cst_9 : f32 to vector<2x16x8x1xf32>
    %33 = arith.mulf %31, %32 : vector<2x16x8x1xf32>
    %34 = vector.shape_cast %25 : vector<1x1x1x128xi1> to vector<1x1x1x128xi1>
    %35 = vector.broadcast %34 : vector<1x1x1x128xi1> to vector<2x16x8x128xi1>
    %36 = vector.shape_cast %33 : vector<2x16x8x1xf32> to vector<2x16x8x1xf32>
    %37 = vector.broadcast %36 : vector<2x16x8x1xf32> to vector<2x16x8x128xf32>
    %38 = arith.select %35, %37, %20 : vector<2x16x8x128xi1>, vector<2x16x8x128xf32>
    %39 = arith.subf %0, %38 : vector<2x16x8x128xf32>
    %cst_10 = arith.constant 0.000000e+00 : f32
    %40 = vector.broadcast %cst_10 : f32 to vector<2x16x8x128xf32>
    %c0_i32_11 = arith.constant 0 : i32
    %41 = vector.broadcast %c0_i32_11 : i32 to vector<1x1x1x128xi32>
    %42 = arith.cmpi sge, %1, %41 : vector<1x1x1x128xi32>
    %c64_i32_12 = arith.constant 64 : i32
    %43 = vector.broadcast %c64_i32_12 : i32 to vector<1x1x1x128xi32>
    %44 = arith.cmpi slt, %1, %43 : vector<1x1x1x128xi32>
    %45 = arith.andi %42, %44 : vector<1x1x1x128xi1>
    %46 = arith.mulf %39, %39 : vector<2x16x8x128xf32>
    %cst_13 = arith.constant 0.000000e+00 : f32
    %47 = vector.shape_cast %45 : vector<1x1x1x128xi1> to vector<1x1x1x128xi1>
    %48 = vector.broadcast %47 : vector<1x1x1x128xi1> to vector<2x16x8x128xi1>
    %49 = vector.broadcast %cst_13 : f32 to vector<2x16x8x128xf32>
    %50 = arith.select %48, %46, %49 : vector<2x16x8x128xi1>, vector<2x16x8x128xf32>
    %cst_14 = arith.constant dense<0.000000e+00> : vector<2x16x8xf32>
    %51 = vector.multi_reduction <add>, %50, %cst_14 [3] : vector<2x16x8x128xf32> to vector<2x16x8xf32>
    %52 = vector.shape_cast %51 : vector<2x16x8xf32> to vector<2x16x8x1xf32>
    %cst_15 = arith.constant 1.562500e-02 : f32
    %53 = vector.broadcast %cst_15 : f32 to vector<2x16x8x1xf32>
    %54 = arith.mulf %52, %53 : vector<2x16x8x1xf32>
    %55 = vector.shape_cast %45 : vector<1x1x1x128xi1> to vector<1x1x1x128xi1>
    %56 = vector.broadcast %55 : vector<1x1x1x128xi1> to vector<2x16x8x128xi1>
    %57 = vector.shape_cast %54 : vector<2x16x8x1xf32> to vector<2x16x8x1xf32>
    %58 = vector.broadcast %57 : vector<2x16x8x1xf32> to vector<2x16x8x128xf32>
    %59 = arith.select %56, %58, %40 : vector<2x16x8x128xi1>, vector<2x16x8x128xf32>
    %c64_i32_16 = arith.constant 64 : i32
    %60 = vector.broadcast %c64_i32_16 : i32 to vector<1x1x1x128xi32>
    %61 = arith.cmpi sge, %1, %60 : vector<1x1x1x128xi32>
    %c128_i32_17 = arith.constant 128 : i32
    %62 = vector.broadcast %c128_i32_17 : i32 to vector<1x1x1x128xi32>
    %63 = arith.cmpi slt, %1, %62 : vector<1x1x1x128xi32>
    %64 = arith.andi %61, %63 : vector<1x1x1x128xi1>
    %65 = arith.mulf %39, %39 : vector<2x16x8x128xf32>
    %cst_18 = arith.constant 0.000000e+00 : f32
    %66 = vector.shape_cast %64 : vector<1x1x1x128xi1> to vector<1x1x1x128xi1>
    %67 = vector.broadcast %66 : vector<1x1x1x128xi1> to vector<2x16x8x128xi1>
    %68 = vector.broadcast %cst_18 : f32 to vector<2x16x8x128xf32>
    %69 = arith.select %67, %65, %68 : vector<2x16x8x128xi1>, vector<2x16x8x128xf32>
    %cst_19 = arith.constant dense<0.000000e+00> : vector<2x16x8xf32>
    %70 = vector.multi_reduction <add>, %69, %cst_19 [3] : vector<2x16x8x128xf32> to vector<2x16x8xf32>
    %71 = vector.shape_cast %70 : vector<2x16x8xf32> to vector<2x16x8x1xf32>
    %cst_20 = arith.constant 1.562500e-02 : f32
    %72 = vector.broadcast %cst_20 : f32 to vector<2x16x8x1xf32>
    %73 = arith.mulf %71, %72 : vector<2x16x8x1xf32>
    %74 = vector.shape_cast %64 : vector<1x1x1x128xi1> to vector<1x1x1x128xi1>
    %75 = vector.broadcast %74 : vector<1x1x1x128xi1> to vector<2x16x8x128xi1>
    %76 = vector.shape_cast %73 : vector<2x16x8x1xf32> to vector<2x16x8x1xf32>
    %77 = vector.broadcast %76 : vector<2x16x8x1xf32> to vector<2x16x8x128xf32>
    %78 = arith.select %75, %77, %59 : vector<2x16x8x128xi1>, vector<2x16x8x128xf32>
    %cst_21 = arith.constant 9.99999974E-6 : f32
    %79 = vector.broadcast %cst_21 : f32 to vector<2x16x8x128xf32>
    %80 = arith.addf %78, %79 : vector<2x16x8x128xf32>
    %81 = math.rsqrt %80 : vector<2x16x8x128xf32>
    %82 = arith.mulf %39, %81 : vector<2x16x8x128xf32>
    %c0_22 = arith.constant 0 : index
    %c0_23 = arith.constant 0 : index
    %83 = vector.load %arg3[%c0_22, %c0_23] : memref<1x128xf32, #tpu.memory_space<vmem>>, vector<1x128xf32>
    %84 = vector.shape_cast %83 : vector<1x128xf32> to vector<1x1x1x128xf32>
    %85 = vector.broadcast %84 : vector<1x1x1x128xf32> to vector<2x16x8x128xf32>
    %86 = arith.mulf %82, %85 : vector<2x16x8x128xf32>
    %c0_24 = arith.constant 0 : index
    %c0_25 = arith.constant 0 : index
    %87 = vector.load %arg4[%c0_24, %c0_25] : memref<1x128xf32, #tpu.memory_space<vmem>>, vector<1x128xf32>
    %88 = vector.shape_cast %87 : vector<1x128xf32> to vector<1x1x1x128xf32>
    %89 = vector.broadcast %88 : vector<1x1x1x128xf32> to vector<2x16x8x128xf32>
    %90 = arith.addf %86, %89 : vector<2x16x8x128xf32>
    %cst_26 = arith.constant 0.000000e+00 : f32
    %91 = vector.broadcast %cst_26 : f32 to vector<2x1x2x9x128xf32>
    %c0_27 = arith.constant 0 : index
    %c0_28 = arith.constant 0 : index
    %c0_29 = arith.constant 0 : index
    %c0_30 = arith.constant 0 : index
    %c0_31 = arith.constant 0 : index
    %92 = vector.load %arg7[%c0_27, %c0_28, %c0_29, %c0_30, %c0_31] : memref<2x9x2x9x128xf32, #tpu.memory_space<vmem>>, vector<2x1x2x9x128xf32>
    tpu.vector_store %arg7[%c0_27, %c0_28, %c0_29, %c0_30, %c0_31], %91 {strides = array<i32>} : memref<2x9x2x9x128xf32, #tpu.memory_space<vmem>>, vector<2x1x2x9x128xf32>,
    %cst_32 = arith.constant 0.000000e+00 : f32
    %93 = vector.broadcast %cst_32 : f32 to vector<2x9x2x1x128xf32>
    %c0_33 = arith.constant 0 : index
    %c0_34 = arith.constant 0 : index
    %c0_35 = arith.constant 0 : index
    %c0_36 = arith.constant 0 : index
    %c0_37 = arith.constant 0 : index
    %94 = vector.load %arg7[%c0_33, %c0_34, %c0_35, %c0_36, %c0_37] : memref<2x9x2x9x128xf32, #tpu.memory_space<vmem>>, vector<2x9x2x1x128xf32>
    tpu.vector_store %arg7[%c0_33, %c0_34, %c0_35, %c0_36, %c0_37], %93 {strides = array<i32>} : memref<2x9x2x9x128xf32, #tpu.memory_space<vmem>>, vector<2x9x2x1x128xf32>,
    %95 = vector.shape_cast %90 : vector<2x16x8x128xf32> to vector<2x8x2x8x128xf32>
    %c0_38 = arith.constant 0 : index
    %c1 = arith.constant 1 : index
    %c0_39 = arith.constant 0 : index
    %c1_40 = arith.constant 1 : index
    %c0_41 = arith.constant 0 : index
    %96 = vector.load %arg7[%c0_38, %c1, %c0_39, %c1_40, %c0_41] : memref<2x9x2x9x128xf32, #tpu.memory_space<vmem>>, vector<2x8x2x8x128xf32>
    tpu.vector_store %arg7[%c0_38, %c1, %c0_39, %c1_40, %c0_41], %95 {strides = array<i32>} : memref<2x9x2x9x128xf32, #tpu.memory_space<vmem>>, vector<2x8x2x8x128xf32>,
    %c0_42 = arith.constant 0 : index
    %c0_43 = arith.constant 0 : index
    %c1_44 = arith.constant 1 : index
    %c0_45 = arith.constant 0 : index
    %c64 = arith.constant 64 : index
    %97 = vector.load %arg7[%c0_42, %c0_43, %c1_44, %c0_45, %c64] : memref<2x9x2x9x128xf32, #tpu.memory_space<vmem>>, vector<2x8x1x8x64xf32>
    %98 = vector.shape_cast %97 : vector<2x8x1x8x64xf32> to vector<2x8x8x64xf32>
    %99 = vector.shape_cast %98 : vector<2x8x8x64xf32> to vector<128x64xf32>
    %100 = arith.truncf %99 : vector<128x64xf32> to vector<128x64xbf16>
    %c0_46 = arith.constant 0 : index
    %c0_47 = arith.constant 0 : index
    %101 = vector.load %arg8[%c0_46, %c0_47] : memref<128x576xbf16, #tpu.memory_space<vmem>>, vector<128x64xbf16>
    tpu.vector_store %arg8[%c0_46, %c0_47], %100 {strides = array<i32>} : memref<128x576xbf16, #tpu.memory_space<vmem>>, vector<128x64xbf16>,
    %c0_48 = arith.constant 0 : index
    %c0_49 = arith.constant 0 : index
    %c1_50 = arith.constant 1 : index
    %c1_51 = arith.constant 1 : index
    %c0_52 = arith.constant 0 : index
    %102 = vector.load %arg7[%c0_48, %c0_49, %c1_50, %c1_51, %c0_52] : memref<2x9x2x9x128xf32, #tpu.memory_space<vmem>>, vector<2x8x1x8x64xf32>
    %103 = vector.shape_cast %102 : vector<2x8x1x8x64xf32> to vector<2x8x8x64xf32>
    %104 = vector.shape_cast %103 : vector<2x8x8x64xf32> to vector<128x64xf32>
    %105 = arith.truncf %104 : vector<128x64xf32> to vector<128x64xbf16>
    %c0_53 = arith.constant 0 : index
    %c64_54 = arith.constant 64 : index
    %106 = vector.load %arg8[%c0_53, %c64_54] : memref<128x576xbf16, #tpu.memory_space<vmem>>, vector<128x64xbf16>
    tpu.vector_store %arg8[%c0_53, %c64_54], %105 {strides = array<i32>} : memref<128x576xbf16, #tpu.memory_space<vmem>>, vector<128x64xbf16>,
    %c0_55 = arith.constant 0 : index
    %c0_56 = arith.constant 0 : index
    %c1_57 = arith.constant 1 : index
    %c1_58 = arith.constant 1 : index
    %c64_59 = arith.constant 64 : index
    %107 = vector.load %arg7[%c0_55, %c0_56, %c1_57, %c1_58, %c64_59] : memref<2x9x2x9x128xf32, #tpu.memory_space<vmem>>, vector<2x8x1x8x64xf32>
    %108 = vector.shape_cast %107 : vector<2x8x1x8x64xf32> to vector<2x8x8x64xf32>
    %109 = vector.shape_cast %108 : vector<2x8x8x64xf32> to vector<128x64xf32>
    %110 = arith.truncf %109 : vector<128x64xf32> to vector<128x64xbf16>
    %c0_60 = arith.constant 0 : index
    %c128 = arith.constant 128 : index
    %111 = vector.load %arg8[%c0_60, %c128] : memref<128x576xbf16, #tpu.memory_space<vmem>>, vector<128x64xbf16>
    tpu.vector_store %arg8[%c0_60, %c128], %110 {strides = array<i32>} : memref<128x576xbf16, #tpu.memory_space<vmem>>, vector<128x64xbf16>,
    %c0_61 = arith.constant 0 : index
    %c1_62 = arith.constant 1 : index
    %c0_63 = arith.constant 0 : index
    %c0_64 = arith.constant 0 : index
    %c64_65 = arith.constant 64 : index
    %112 = vector.load %arg7[%c0_61, %c1_62, %c0_63, %c0_64, %c64_65] : memref<2x9x2x9x128xf32, #tpu.memory_space<vmem>>, vector<2x8x1x8x64xf32>
    %113 = vector.shape_cast %112 : vector<2x8x1x8x64xf32> to vector<2x8x8x64xf32>
    %114 = vector.shape_cast %113 : vector<2x8x8x64xf32> to vector<128x64xf32>
    %115 = arith.truncf %114 : vector<128x64xf32> to vector<128x64xbf16>
    %c0_66 = arith.constant 0 : index
    %c192 = arith.constant 192 : index
    %116 = vector.load %arg8[%c0_66, %c192] : memref<128x576xbf16, #tpu.memory_space<vmem>>, vector<128x64xbf16>
    tpu.vector_store %arg8[%c0_66, %c192], %115 {strides = array<i32>} : memref<128x576xbf16, #tpu.memory_space<vmem>>, vector<128x64xbf16>,
    %c0_67 = arith.constant 0 : index
    %c1_68 = arith.constant 1 : index
    %c0_69 = arith.constant 0 : index
    %c1_70 = arith.constant 1 : index
    %c0_71 = arith.constant 0 : index
    %117 = vector.load %arg7[%c0_67, %c1_68, %c0_69, %c1_70, %c0_71] : memref<2x9x2x9x128xf32, #tpu.memory_space<vmem>>, vector<2x8x1x8x64xf32>
    %118 = vector.shape_cast %117 : vector<2x8x1x8x64xf32> to vector<2x8x8x64xf32>
    %119 = vector.shape_cast %118 : vector<2x8x8x64xf32> to vector<128x64xf32>
    %120 = arith.truncf %119 : vector<128x64xf32> to vector<128x64xbf16>
    %c0_72 = arith.constant 0 : index
    %c256 = arith.constant 256 : index
    %121 = vector.load %arg8[%c0_72, %c256] : memref<128x576xbf16, #tpu.memory_space<vmem>>, vector<128x64xbf16>
    tpu.vector_store %arg8[%c0_72, %c256], %120 {strides = array<i32>} : memref<128x576xbf16, #tpu.memory_space<vmem>>, vector<128x64xbf16>,
    %c0_73 = arith.constant 0 : index
    %c1_74 = arith.constant 1 : index
    %c0_75 = arith.constant 0 : index
    %c1_76 = arith.constant 1 : index
    %c64_77 = arith.constant 64 : index
    %122 = vector.load %arg7[%c0_73, %c1_74, %c0_75, %c1_76, %c64_77] : memref<2x9x2x9x128xf32, #tpu.memory_space<vmem>>, vector<2x8x1x8x64xf32>
    %123 = vector.shape_cast %122 : vector<2x8x1x8x64xf32> to vector<2x8x8x64xf32>
    %124 = vector.shape_cast %123 : vector<2x8x8x64xf32> to vector<128x64xf32>
    %125 = arith.truncf %124 : vector<128x64xf32> to vector<128x64xbf16>
    %c0_78 = arith.constant 0 : index
    %c320 = arith.constant 320 : index
    %126 = vector.load %arg8[%c0_78, %c320] : memref<128x576xbf16, #tpu.memory_space<vmem>>, vector<128x64xbf16>
    tpu.vector_store %arg8[%c0_78, %c320], %125 {strides = array<i32>} : memref<128x576xbf16, #tpu.memory_space<vmem>>, vector<128x64xbf16>,
    %c0_79 = arith.constant 0 : index
    %c1_80 = arith.constant 1 : index
    %c1_81 = arith.constant 1 : index
    %c0_82 = arith.constant 0 : index
    %c64_83 = arith.constant 64 : index
    %127 = vector.load %arg7[%c0_79, %c1_80, %c1_81, %c0_82, %c64_83] : memref<2x9x2x9x128xf32, #tpu.memory_space<vmem>>, vector<2x8x1x8x64xf32>
    %128 = vector.shape_cast %127 : vector<2x8x1x8x64xf32> to vector<2x8x8x64xf32>
    %129 = vector.shape_cast %128 : vector<2x8x8x64xf32> to vector<128x64xf32>
    %130 = arith.truncf %129 : vector<128x64xf32> to vector<128x64xbf16>
    %c0_84 = arith.constant 0 : index
    %c384 = arith.constant 384 : index
    %131 = vector.load %arg8[%c0_84, %c384] : memref<128x576xbf16, #tpu.memory_space<vmem>>, vector<128x64xbf16>
    tpu.vector_store %arg8[%c0_84, %c384], %130 {strides = array<i32>} : memref<128x576xbf16, #tpu.memory_space<vmem>>, vector<128x64xbf16>,
    %c0_85 = arith.constant 0 : index
    %c1_86 = arith.constant 1 : index
    %c1_87 = arith.constant 1 : index
    %c1_88 = arith.constant 1 : index
    %c0_89 = arith.constant 0 : index
    %132 = vector.load %arg7[%c0_85, %c1_86, %c1_87, %c1_88, %c0_89] : memref<2x9x2x9x128xf32, #tpu.memory_space<vmem>>, vector<2x8x1x8x64xf32>
    %133 = vector.shape_cast %132 : vector<2x8x1x8x64xf32> to vector<2x8x8x64xf32>
    %134 = vector.shape_cast %133 : vector<2x8x8x64xf32> to vector<128x64xf32>
    %135 = arith.truncf %134 : vector<128x64xf32> to vector<128x64xbf16>
    %c0_90 = arith.constant 0 : index
    %c448 = arith.constant 448 : index
    %136 = vector.load %arg8[%c0_90, %c448] : memref<128x576xbf16, #tpu.memory_space<vmem>>, vector<128x64xbf16>
    tpu.vector_store %arg8[%c0_90, %c448], %135 {strides = array<i32>} : memref<128x576xbf16, #tpu.memory_space<vmem>>, vector<128x64xbf16>,
    %c0_91 = arith.constant 0 : index
    %c1_92 = arith.constant 1 : index
    %c1_93 = arith.constant 1 : index
    %c1_94 = arith.constant 1 : index
    %c64_95 = arith.constant 64 : index
    %137 = vector.load %arg7[%c0_91, %c1_92, %c1_93, %c1_94, %c64_95] : memref<2x9x2x9x128xf32, #tpu.memory_space<vmem>>, vector<2x8x1x8x64xf32>
    %138 = vector.shape_cast %137 : vector<2x8x1x8x64xf32> to vector<2x8x8x64xf32>
    %139 = vector.shape_cast %138 : vector<2x8x8x64xf32> to vector<128x64xf32>
    %140 = arith.truncf %139 : vector<128x64xf32> to vector<128x64xbf16>
    %c0_96 = arith.constant 0 : index
    %c512 = arith.constant 512 : index
    %141 = vector.load %arg8[%c0_96, %c512] : memref<128x576xbf16, #tpu.memory_space<vmem>>, vector<128x64xbf16>
    tpu.vector_store %arg8[%c0_96, %c512], %140 {strides = array<i32>} : memref<128x576xbf16, #tpu.memory_space<vmem>>, vector<128x64xbf16>,
    %c0_97 = arith.constant 0 : index
    %c0_98 = arith.constant 0 : index
    %142 = vector.load %arg8[%c0_97, %c0_98] : memref<128x576xbf16, #tpu.memory_space<vmem>>, vector<128x576xbf16>
    %c0_99 = arith.constant 0 : index
    %c0_100 = arith.constant 0 : index
    %143 = vector.load %arg2[%c0_99, %c0_100] : memref<576x128xbf16, #tpu.memory_space<vmem>>, vector<576x128xbf16>
    %cst_101 = arith.constant dense<0.000000e+00> : vector<128x128xf32>
    %144 = tpu.matmul %142, %143, %cst_101 {dimension_numbers = #tpu.dot_dimension_numbers<[1], [0], [0], [1], [0, 0, 1, 1], [], []>} : vector<128x576xbf16>, vector<576x128xbf16>, vector<128x128xf32> -> vector<128x128xf32>
    %c0_102 = arith.constant 0 : index
    %c0_103 = arith.constant 0 : index
    %145 = vector.load %arg5[%c0_102, %c0_103] : memref<1x128xf32, #tpu.memory_space<vmem>>, vector<1x128xf32>
    %146 = vector.broadcast %145 : vector<1x128xf32> to vector<128x128xf32>
    %147 = arith.addf %144, %146 : vector<128x128xf32>
    %148 = vector.shape_cast %147 : vector<128x128xf32> to vector<2x64x128xf32>
    %c0_104 = arith.constant 0 : index
    %c0_105 = arith.constant 0 : index
    %c0_106 = arith.constant 0 : index
    %149 = vector.load %arg6[%c0_104, %c0_105, %c0_106] : memref<2x64x128xf32, #tpu.memory_space<vmem>>, vector<2x64x128xf32>
    tpu.vector_store %arg6[%c0_104, %c0_105, %c0_106], %148 {strides = array<i32>} : memref<2x64x128xf32, #tpu.memory_space<vmem>>, vector<2x64x128xf32>,
    return
  }
  func.func @transform_0(%arg0: i32) -> (i32, i32, i32, i32) {
    %c0_i32 = arith.constant 0 : i32
    %c0_i32_0 = arith.constant 0 : i32
    %c0_i32_1 = arith.constant 0 : i32
    %c0_i32_2 = arith.constant 0 : i32
    return %arg0, %c0_i32, %c0_i32_0, %c0_i32_1 : i32, i32, i32, i32
  }
  func.func @transform_1(%arg0: i32) -> (i32, i32) {
    %c0_i32 = arith.constant 0 : i32
    %c0_i32_0 = arith.constant 0 : i32
    %c0_i32_1 = arith.constant 0 : i32
    return %c0_i32, %c0_i32_0 : i32, i32
  }
  func.func @transform_2(%arg0: i32) -> (i32, i32) {
    %c0_i32 = arith.constant 0 : i32
    %c0_i32_0 = arith.constant 0 : i32
    %c0_i32_1 = arith.constant 0 : i32
    return %c0_i32, %c0_i32_0 : i32, i32
  }
  func.func @transform_3(%arg0: i32) -> (i32, i32) {
    %c0_i32 = arith.constant 0 : i32
    %c0_i32_0 = arith.constant 0 : i32
    %c0_i32_1 = arith.constant 0 : i32
    return %c0_i32, %c0_i32_0 : i32, i32
  }
  func.func @transform_4(%arg0: i32) -> (i32, i32) {
    %c0_i32 = arith.constant 0 : i32
    %c0_i32_0 = arith.constant 0 : i32
    %c0_i32_1 = arith.constant 0 : i32
    return %c0_i32, %c0_i32_0 : i32, i32
  }
  func.func @transform_5(%arg0: i32) -> (i32, i32, i32) {
    %c0_i32 = arith.constant 0 : i32
    %c0_i32_0 = arith.constant 0 : i32
    %c0_i32_1 = arith.constant 0 : i32
    return %arg0, %c0_i32, %c0_i32_0 : i32, i32, i32
  }
}

</mosaic_0001>

<bundles_post_ra>
// kernel: tpu_custom_call.1
= control target key start
LH: loop header
LB: loop body
LE: loop exit
PB: predicated region body
PF: predicated region fallthrough
CT: control target
= control target key end

     0   :  { %10 = vsyncpa [#allocation5], 0  ;;  %s3950_s0 = inlined_call_operand.hbm [shape: f32[2,16,8,128], index: 0, kind: input, shape index: {}]   ;;  %s3951_s1 = inlined_call_operand.hbm [shape: bf16[576,128], index: 1, kind: input, shape index: {}]   ;;  %s3952_s2 = inlined_call_operand.vmem [shape: f32[1,128], index: 2, kind: input, shape index: {}]   ;;  %s3953_s3 = inlined_call_operand.vmem [shape: f32[1,128], index: 3, kind: input, shape index: {}]   ;;  %s3954_s4 = inlined_call_operand.vmem [shape: f32[1,128], index: 4, kind: input, shape index: {}]   ;;  %s3955_s5 = inlined_call_operand.hbm [shape: f32[2,64,128], index: 5, kind: output, shape index: {}]  }
   0x1   :  { %11 = vsyncpa [#allocation8], 0 }
   0x2   :  { %12 = vsyncpa [#allocation6], 0  ;;  %s2620_s18 = smov [#allocation4]   ;;  %s2548_s22 = scalar_lea.hbm %s3950_s0, 4096 }
   0x3   :  { %s18_s19 = sshll.u32 %s2620_s18, 4  ;;  %p2549_p0 = scmp.ne.s32.totalorder %s3950_s0, %s2548_s22  ;;  %s19_s19 = int_to_ptr.vmem [resolvable:$true] %s18_s19 }
   0x4   :  { %p2552_p1 = scmp.lt.u32.totalorder %s2548_s22, %s3950_s0 }
   0x6   :  { %p2554_p2 = pnand %p2552_p1, %p2549_p0 }
   0x8   :  { %2557 = shalt.err (!%p2554_p2)
}
   0x9   :  { %s2558_s27 = scalar_lea.vmem %s19_s19, 4096  ;;  %p2563_p4 = scmp.lt.s32.totalorder %s19_s19, %s19_s19 }
   0xa   :  { %p2559_p3 = scmp.ne.s32.totalorder %s19_s19, %s2558_s27  ;;  %p2564_p5 = scmp.lt.s32.totalorder %s2558_s27, %s2558_s27 }
   0xc   :  { %p2565_p6 = por %p2564_p5, %p2563_p4 }
   0xe   :  { %p2566_p7 = pnand %p2565_p6, %p2559_p3 }
  0x10   :  { %2569 = shalt.err (!%p2566_p7)
}
  0x11   :  { %s2621_s28 = smov 128   ;;  %s2622_s29 = smov 8  }
  0x12   :  { %24 = dma.hbm_to_vmem [thread:$0]  %s3950_s0, 4096, %s19_s19, [#allocation5], %s2621_s28, %s2621_s28, %s2622_s29  }
  0x13   :  { %s2623_s7 = smov [#allocation7]   ;;  %s2570_s11 = scalar_lea.hbm %s3951_s1, 4608 }
  0x14   :  { %s30_s8 = sshll.u32 %s2623_s7, 4  ;;  %p2571_p8 = scmp.ne.s32.totalorder %s3951_s1, %s2570_s11  ;;  %s31_s8 = int_to_ptr.vmem [resolvable:$true] %s30_s8 }
  0x15   :  { %p2574_p9 = scmp.lt.u32.totalorder %s2570_s11, %s3951_s1 }
  0x17   :  { %p2576_p10 = pnand %p2574_p9, %p2571_p8 }
  0x19   :  { %2579 = shalt.err (!%p2576_p10)
}
  0x1a   :  { %s2580_s16 = scalar_lea.vmem %s31_s8, 4608  ;;  %p2585_p12 = scmp.lt.s32.totalorder %s31_s8, %s31_s8 }
  0x1b   :  { %p2581_p11 = scmp.ne.s32.totalorder %s31_s8, %s2580_s16  ;;  %p2586_p13 = scmp.lt.s32.totalorder %s2580_s16, %s2580_s16 }
  0x1d   :  { %p2587_p0 = por %p2586_p13, %p2585_p12 }
  0x1f   :  { %p2588_p1 = pnand %p2587_p0, %p2581_p11 }
  0x21   :  { %2591 = shalt.err (!%p2588_p1)
}
  0x22   :  { %s2624_s0 = smov 64   ;;  %s2625_s17 = smov 4  }
  0x23   :  { %36 = dma.hbm_to_vmem [thread:$0]  %s3951_s1, 4608, %s31_s8, [#allocation8], %s2624_s0, %s2624_s0, %s2625_s17  }
  0x24   :  { %2614 = dma.done.wait [#allocation5], 4096  }
  0x25   :  { %2615 = vsyncadd [#allocation5], 4294963200 }
  0x26   :  { %2616 = dma.done.wait [#allocation8], 4608  }
  0x27   :  { %2617 = vsyncadd [#allocation8], 4294962688  ;;  %v82_v0 = vlaneseq  ;;  %v2626_v1 = vmov 0.0   ;;  %v2691_v3 = vld [vmem:[#allocation4 + $0x8] sm:$0xff]  ;;  %v2693_v4 = vld [vmem:[#allocation4 + $0x18] sm:$0xff]  ;;  %vm1106_vm2 = vcmask 523264  }
  0x28   :  { %974 = vst [vmem:[#allocation2 + $0x10] sm:$0xff] %v2626_v1  ;;  %975 = vst [vmem:[#allocation2 + $0x18] sm:$0x1] %v2626_v1  ;;  %v2707_v9 = vld [vmem:[#allocation4 + $0x28] sm:$0xff]  ;;  %v2709_v10 = vld [vmem:[#allocation4 + $0x38] sm:$0xff]  ;;  %vm1171_vm3 = vcmask 1048064  }
  0x29   :  { %978 = vst [vmem:[#allocation2 + $0x130] sm:$0xff] %v2626_v1  ;;  %979 = vst [vmem:[#allocation2 + $0x138] sm:$0x1] %v2626_v1  ;;  %v2687_v2 = vand.u32 127, %v82_v0  ;;  %v2717_v13 = vld [vmem:[#allocation4 + $0x48] sm:$0xff]  ;;  %v2725_v16 = vld [vmem:[#allocation4 + $0x58] sm:$0xff] }
  0x2a   :  { %982 = vst [vmem:[#allocation2 + $0x20] sm:$0x1] %v2626_v1  ;;  %983 = vst [vmem:[#allocation2 + $0x30] sm:$0x1] %v2626_v1  ;;  %v2727_v17 = vld [vmem:[#allocation4 + $0x68] sm:$0xff]  ;;  %v2729_v18 = vld [vmem:[#allocation4 + $0x78] sm:$0xff] }
  0x2b   :  { %984 = vst [vmem:[#allocation2 + $0x40] sm:$0x1] %v2626_v1  ;;  %985 = vst [vmem:[#allocation2 + $0x50] sm:$0x1] %v2626_v1  ;;  %vm85_vm0 = vcmp.lt.s32.totalorder %v2687_v2, 64  ;;  %vm249_vm1 = vcmp.ge.s32.totalorder %v2687_v2, 64 }
  0x2c   :  { %986 = vst [vmem:[#allocation2 + $0x60] sm:$0x1] %v2626_v1  ;;  %987 = vst [vmem:[#allocation2 + $0x70] sm:$0x1] %v2626_v1  ;;  %v90_v5 = vsel %vm85_vm0, %v2691_v3, 0.0  ;;  %v255_v6 = vsel %vm249_vm1, %v2691_v3, 0.0 }
  0x2d   :  { %988 = vst [vmem:[#allocation2 + $0x80] sm:$0x1] %v2626_v1  ;;  %989 = vst [vmem:[#allocation2 + $0x90] sm:$0x1] %v2626_v1  ;;  %123 = vadd.xlane.f32.xlu0 %v90_v5  ;;  %288 = vadd.xlane.f32.xlu1 %v255_v6  ;;  %v92_v7 = vsel %vm85_vm0, %v2693_v4, 0.0  ;;  %v257_v8 = vsel %vm249_vm1, %v2693_v4, 0.0 }
  0x2e   :  { %990 = vst [vmem:[#allocation2 + $0xa0] sm:$0x1] %v2626_v1  ;;  %991 = vst [vmem:[#allocation2 + $0xb0] sm:$0x1] %v2626_v1  ;;  %v94_v11 = vsel %vm85_vm0, %v2707_v9, 0.0  ;;  %v96_v12 = vsel %vm85_vm0, %v2709_v10, 0.0 }
  0x2f   :  { %992 = vst [vmem:[#allocation2 + $0xc0] sm:$0x1] %v2626_v1  ;;  %993 = vst [vmem:[#allocation2 + $0xd0] sm:$0x1] %v2626_v1  ;;  %v259_v14 = vsel %vm249_vm1, %v2707_v9, 0.0  ;;  %v261_v15 = vsel %vm249_vm1, %v2709_v10, 0.0 }
  0x30   :  { %994 = vst [vmem:[#allocation2 + $0xe0] sm:$0x1] %v2626_v1  ;;  %995 = vst [vmem:[#allocation2 + $0xf0] sm:$0x1] %v2626_v1  ;;  %v98_v19 = vsel %vm85_vm0, %v2717_v13, 0.0  ;;  %v100_v20 = vsel %vm85_vm0, %v2725_v16, 0.0 }
  0x31   :  { %996 = vst [vmem:[#allocation2 + $0x100] sm:$0x1] %v2626_v1  ;;  %997 = vst [vmem:[#allocation2 + $0x110] sm:$0x1] %v2626_v1  ;;  %127 = vadd.xlane.f32.xlu0 %v92_v7  ;;  %292 = vadd.xlane.f32.xlu1 %v257_v8  ;;  %v263_v21 = vsel %vm249_vm1, %v2717_v13, 0.0  ;;  %v265_v22 = vsel %vm249_vm1, %v2725_v16, 0.0 }
  0x32   :  { %1000 = vst [vmem:[#allocation2 + $0x140] sm:$0x1] %v2626_v1  ;;  %1001 = vst [vmem:[#allocation2 + $0x150] sm:$0x1] %v2626_v1  ;;  %v102_v23 = vsel %vm85_vm0, %v2727_v17, 0.0  ;;  %v2746_v24 = vld [vmem:[#allocation4 + $0x88] sm:$0xff] }
  0x33   :  { %1002 = vst [vmem:[#allocation2 + $0x160] sm:$0x1] %v2626_v1  ;;  %1003 = vst [vmem:[#allocation2 + $0x170] sm:$0x1] %v2626_v1  ;;  %v104_v25 = vsel %vm85_vm0, %v2729_v18, 0.0  ;;  %v267_v26 = vsel %vm249_vm1, %v2727_v17, 0.0 }
  0x34   :  { %1004 = vst [vmem:[#allocation2 + $0x180] sm:$0x1] %v2626_v1  ;;  %1005 = vst [vmem:[#allocation2 + $0x190] sm:$0x1] %v2626_v1  ;;  %v269_v27 = vsel %vm249_vm1, %v2729_v18, 0.0  ;;  %v2757_v28 = vld [vmem:[#allocation4 + $0x98] sm:$0xff] }
  0x35   :  { %1006 = vst [vmem:[#allocation2 + $0x1a0] sm:$0x1] %v2626_v1  ;;  %1007 = vst [vmem:[#allocation2 + $0x1b0] sm:$0x1] %v2626_v1  ;;  %131 = vadd.xlane.f32.xlu0 %v94_v11  ;;  %135 = vadd.xlane.f32.xlu1 %v96_v12  ;;  %v106_v29 = vsel %vm85_vm0, %v2746_v24, 0.0  ;;  %v2762_v30 = vld [vmem:[#allocation4 + $0xa8] sm:$0xff] }
  0x36   :  { %1008 = vst [vmem:[#allocation2 + $0x1c0] sm:$0x1] %v2626_v1  ;;  %1009 = vst [vmem:[#allocation2 + $0x1d0] sm:$0x1] %v2626_v1  ;;  %v108_v31 = vsel %vm85_vm0, %v2757_v28, 0.0  ;;  %v2767_v32 = vld [vmem:[#allocation4 + $0xb8] sm:$0xff] }
  0x37   :  { %1010 = vst [vmem:[#allocation2 + $0x1e0] sm:$0x1] %v2626_v1  ;;  %1011 = vst [vmem:[#allocation2 + $0x1f0] sm:$0x1] %v2626_v1  ;;  %v271_v33 = vsel %vm249_vm1, %v2746_v24, 0.0  ;;  %v273_v34 = vsel %vm249_vm1, %v2757_v28, 0.0 }
  0x38   :  { %1012 = vst [vmem:[#allocation2 + $0x200] sm:$0x1] %v2626_v1  ;;  %1013 = vst [vmem:[#allocation2 + $0x210] sm:$0x1] %v2626_v1  ;;  %v110_v35 = vsel %vm85_vm0, %v2762_v30, 0.0  ;;  %v112_v36 = vsel %vm85_vm0, %v2767_v32, 0.0 }
  0x39   :  { %1014 = vst [vmem:[#allocation2 + $0x220] sm:$0x1] %v2626_v1  ;;  %1015 = vst [vmem:[#allocation2 + $0x230] sm:$0x1] %v2626_v1  ;;  %296 = vadd.xlane.f32.xlu0 %v259_v14  ;;  %300 = vadd.xlane.f32.xlu1 %v261_v15  ;;  %v275_v37 = vsel %vm249_vm1, %v2762_v30, 0.0  ;;  %v277_v38 = vsel %vm249_vm1, %v2767_v32, 0.0 }
  0x3a   :  { %981 = vst [vmem:[#allocation2 + $0x10] sm:$0x1] %v2626_v1  ;;  %999 = vst [vmem:[#allocation2 + $0x130] sm:$0x1] %v2626_v1  ;;  %v2787_v39 = vld [vmem:[#allocation4 + $0xc8] sm:$0xff]  ;;  %v2789_v40 = vld [vmem:[#allocation4 + $0xd8] sm:$0xff] }
  0x3b   :  { %v114_v41 = vsel %vm85_vm0, %v2787_v39, 0.0  ;;  %v116_v42 = vsel %vm85_vm0, %v2789_v40, 0.0  ;;  %v279_v43 = vsel %vm249_vm1, %v2787_v39, 0.0  ;;  %v281_v44 = vsel %vm249_vm1, %v2789_v40, 0.0  ;;  %v2803_v45 = vld [vmem:[#allocation4 + $0xe8] sm:$0xff]  ;;  %v2805_v46 = vld [vmem:[#allocation4 + $0xf8] sm:$0xff] }
  0x3c   :  { %v118_v47 = vsel %vm85_vm0, %v2803_v45, 0.0  ;;  %v120_v48 = vsel %vm85_vm0, %v2805_v46, 0.0  ;;  %v283_v49 = vsel %vm249_vm1, %v2803_v45, 0.0  ;;  %v285_v50 = vsel %vm249_vm1, %v2805_v46, 0.0  ;;  %v2819_v51 = vld [vmem:[#allocation4] sm:$0xff]  ;;  %v2821_v52 = vld [vmem:[#allocation4 + $0x10] sm:$0xff] }
  0x3d   :  { %139 = vadd.xlane.f32.xlu0 %v98_v19  ;;  %143 = vadd.xlane.f32.xlu1 %v100_v20  ;;  %v89_v53 = vsel %vm85_vm0, %v2819_v51, 0.0  ;;  %v91_v54 = vsel %vm85_vm0, %v2821_v52, 0.0  ;;  %v254_v55 = vsel %vm249_vm1, %v2819_v51, 0.0  ;;  %v256_v56 = vsel %vm249_vm1, %v2821_v52, 0.0  ;;  %v2835_v57 = vld [vmem:[#allocation4 + $0x20] sm:$0xff]  ;;  %v2837_v58 = vld [vmem:[#allocation4 + $0x30] sm:$0xff] }
  0x3e   :  { %v93_v59 = vsel %vm85_vm0, %v2835_v57, 0.0  ;;  %v95_v60 = vsel %vm85_vm0, %v2837_v58, 0.0  ;;  %v258_v61 = vsel %vm249_vm1, %v2835_v57, 0.0  ;;  %v260_v62 = vsel %vm249_vm1, %v2837_v58, 0.0  ;;  %v2851_v63 = vld [vmem:[#allocation4 + $0x40] sm:$0xff]  ;;  %v2853_v0 = vld [vmem:[#allocation4 + $0x50] sm:$0xff] }
  0x3f   :  { %v97_v1 = vsel %vm85_vm0, %v2851_v63, 0.0  ;;  %v99_v5 = vsel %vm85_vm0, %v2853_v0, 0.0  ;;  %v262_v6 = vsel %vm249_vm1, %v2851_v63, 0.0  ;;  %v264_v7 = vsel %vm249_vm1, %v2853_v0, 0.0  ;;  %v2867_v8 = vld [vmem:[#allocation4 + $0x60] sm:$0xff]  ;;  %v2869_v11 = vld [vmem:[#allocation4 + $0x70] sm:$0xff] }
  0x40   :  { %v101_v12 = vsel %vm85_vm0, %v2867_v8, 0.0  ;;  %v103_v14 = vsel %vm85_vm0, %v2869_v11, 0.0  ;;  %v266_v15 = vsel %vm249_vm1, %v2867_v8, 0.0  ;;  %v268_v19 = vsel %vm249_vm1, %v2869_v11, 0.0  ;;  %v2883_v20 = vld [vmem:[#allocation4 + $0x80] sm:$0xff] }
  0x41   :  { %304 = vadd.xlane.f32.xlu0 %v263_v21  ;;  %308 = vadd.xlane.f32.xlu1 %v265_v22  ;;  %v2885_v21 = vld [vmem:[#allocation4 + $0x90] sm:$0xff]  ;;  %v105_v22 = vsel %vm85_vm0, %v2883_v20, 0.0 }
  0x45   :  { %147 = vadd.xlane.f32.xlu0 %v102_v23  ;;  %151 = vadd.xlane.f32.xlu1 %v104_v25  ;;  %v107_v23 = vsel %vm85_vm0, %v2885_v21, 0.0  ;;  %v270_v25 = vsel %vm249_vm1, %v2883_v20, 0.0 }
  0x49   :  { %312 = vadd.xlane.f32.xlu0 %v267_v26  ;;  %316 = vadd.xlane.f32.xlu1 %v269_v27  ;;  %v272_v26 = vsel %vm249_vm1, %v2885_v21, 0.0  ;;  %v2899_v27 = vld [vmem:[#allocation4 + $0xa0] sm:$0xff] }
  0x4d   :  { %155 = vadd.xlane.f32.xlu0 %v106_v29  ;;  %159 = vadd.xlane.f32.xlu1 %v108_v31  ;;  %v2901_v29 = vld [vmem:[#allocation4 + $0xb0] sm:$0xff]  ;;  %v109_v31 = vsel %vm85_vm0, %v2899_v27, 0.0 }
  0x51   :  { %320 = vadd.xlane.f32.xlu0 %v271_v33  ;;  %324 = vadd.xlane.f32.xlu1 %v273_v34  ;;  %v111_v33 = vsel %vm85_vm0, %v2901_v29, 0.0  ;;  %v274_v34 = vsel %vm249_vm1, %v2899_v27, 0.0 }
  0x55   :  { %163 = vadd.xlane.f32.xlu0 %v110_v35  ;;  %167 = vadd.xlane.f32.xlu1 %v112_v36  ;;  %v276_v35 = vsel %vm249_vm1, %v2901_v29, 0.0  ;;  %v2915_v36 = vld [vmem:[#allocation4 + $0xd0] sm:$0xff] }
  0x59   :  { %328 = vadd.xlane.f32.xlu0 %v275_v37  ;;  %332 = vadd.xlane.f32.xlu1 %v277_v38  ;;  %v2917_v37 = vld [vmem:[#allocation4 + $0xc0] sm:$0xff]  ;;  %v115_v38 = vsel %vm85_vm0, %v2915_v36, 0.0 }
  0x5d   :  { %171 = vadd.xlane.f32.xlu0 %v114_v41  ;;  %175 = vadd.xlane.f32.xlu1 %v116_v42  ;;  %v113_v41 = vsel %vm85_vm0, %v2917_v37, 0.0  ;;  %v280_v42 = vsel %vm249_vm1, %v2915_v36, 0.0 }
  0x61   :  { %336 = vadd.xlane.f32.xlu0 %v279_v43  ;;  %340 = vadd.xlane.f32.xlu1 %v281_v44  ;;  %v278_v43 = vsel %vm249_vm1, %v2917_v37, 0.0  ;;  %v2931_v44 = vld [vmem:[#allocation4 + $0xe0] sm:$0xff] }
  0x65   :  { %179 = vadd.xlane.f32.xlu0 %v118_v47  ;;  %183 = vadd.xlane.f32.xlu1 %v120_v48  ;;  %v2933_v47 = vld [vmem:[#allocation4 + $0xf0] sm:$0xff]  ;;  %v117_v48 = vsel %vm85_vm0, %v2931_v44, 0.0 }
  0x69   :  { %344 = vadd.xlane.f32.xlu0 %v283_v49  ;;  %348 = vadd.xlane.f32.xlu1 %v285_v50  ;;  %v119_v49 = vsel %vm85_vm0, %v2933_v47, 0.0 }
  0x6d   :  { %121 = vadd.xlane.f32.xlu0 %v89_v53  ;;  %125 = vadd.xlane.f32.xlu1 %v91_v54 }
  0x71   :  { %286 = vadd.xlane.f32.xlu0 %v254_v55  ;;  %290 = vadd.xlane.f32.xlu1 %v256_v56 }
  0x75   :  { %129 = vadd.xlane.f32.xlu0 %v93_v59  ;;  %133 = vadd.xlane.f32.xlu1 %v95_v60 }
  0x79   :  { %294 = vadd.xlane.f32.xlu0 %v258_v61  ;;  %298 = vadd.xlane.f32.xlu1 %v260_v62 }
  0x7d   :  { %137 = vadd.xlane.f32.xlu0 %v97_v1  ;;  %141 = vadd.xlane.f32.xlu1 %v99_v5 }
  0x81   :  { %302 = vadd.xlane.f32.xlu0 %v262_v6  ;;  %306 = vadd.xlane.f32.xlu1 %v264_v7 }
  0x85   :  { %145 = vadd.xlane.f32.xlu0 %v101_v12  ;;  %149 = vadd.xlane.f32.xlu1 %v103_v14 }
  0x89   :  { %310 = vadd.xlane.f32.xlu0 %v266_v15  ;;  %314 = vadd.xlane.f32.xlu1 %v268_v19 }
  0x8d   :  { %153 = vadd.xlane.f32.xlu0 %v105_v22  ;;  %157 = vadd.xlane.f32.xlu1 %v107_v23 }
  0x91   :  { %318 = vadd.xlane.f32.xlu0 %v270_v25  ;;  %322 = vadd.xlane.f32.xlu1 %v272_v26 }
  0x95   :  { %161 = vadd.xlane.f32.xlu0 %v109_v31  ;;  %165 = vadd.xlane.f32.xlu1 %v111_v33 }
  0x99   :  { %326 = vadd.xlane.f32.xlu0 %v274_v34  ;;  %330 = vadd.xlane.f32.xlu1 %v276_v35 }
  0x9d   :  { %173 = vadd.xlane.f32.xlu1 %v115_v38  ;;  %169 = vadd.xlane.f32.xlu0 %v113_v41 }
  0xa1   :  { %338 = vadd.xlane.f32.xlu1 %v280_v42  ;;  %334 = vadd.xlane.f32.xlu0 %v278_v43 }
  0xa5   :  { %177 = vadd.xlane.f32.xlu0 %v117_v48  ;;  %181 = vadd.xlane.f32.xlu1 %v119_v49 }
  0xba   :  { %v124_v50 = vpop.xlane.xlu0 %123  ;;  %v289_v53 = vpop.xlane.xlu1 %288 }
  0xbb   :  { %v186_v54 = vmul.f32 0.015625, %v124_v50  ;;  %v351_v55 = vmul.f32 0.015625, %v289_v53 }
  0xbd   :  { %v218_v56 = vsel %vm85_vm0, %v186_v54, 0.0 }
  0xbe   :  { %v128_v59 = vpop.xlane.xlu0 %127  ;;  %v293_v60 = vpop.xlane.xlu1 %292  ;;  %v383_v61 = vsel %vm249_vm1, %v351_v55, %v218_v56 }
  0xbf   :  { %v188_v62 = vmul.f32 0.015625, %v128_v59  ;;  %v353_v1 = vmul.f32 0.015625, %v293_v60  ;;  %v2946_v5 = vsub.f32 %v2691_v3, %v383_v61 }
  0xc1   :  { %v220_v6 = vsel %vm85_vm0, %v188_v62, 0.0  ;;  %v447_v7 = vmul.f32 %v2946_v5, %v2946_v5 }
  0xc2   :  { %v132_v12 = vpop.xlane.xlu0 %131  ;;  %v136_v14 = vpop.xlane.xlu1 %135  ;;  %v385_v15 = vsel %vm249_vm1, %v353_v1, %v220_v6 }
  0xc3   :  { %v190_v19 = vmul.f32 0.015625, %v132_v12  ;;  %v192_v22 = vmul.f32 0.015625, %v136_v14  ;;  %v479_v23 = vsel %vm85_vm0, %v447_v7, 0.0  ;;  %v2957_v25 = vsub.f32 %v2693_v4, %v385_v15 }
  0xc4   :  { %512 = vadd.xlane.f32.xlu0 %v479_v23  ;;  %v639_v4 = vsel %vm249_vm1, %v447_v7, 0.0 }
  0xc5   :  { %v449_v3 = vmul.f32 %v2957_v25, %v2957_v25  ;;  %v222_v26 = vsel %vm85_vm0, %v190_v19, 0.0  ;;  %v224_v31 = vsel %vm85_vm0, %v192_v22, 0.0 }
  0xc6   :  { %v297_v33 = vpop.xlane.xlu0 %296  ;;  %v301_v34 = vpop.xlane.xlu1 %300 }
  0xc7   :  { %v355_v35 = vmul.f32 0.015625, %v297_v33  ;;  %v357_v38 = vmul.f32 0.015625, %v301_v34  ;;  %v481_v41 = vsel %vm85_vm0, %v449_v3, 0.0  ;;  %v641_v56 = vsel %vm249_vm1, %v449_v3, 0.0 }
  0xc8   :  { %516 = vadd.xlane.f32.xlu1 %v481_v41  ;;  %672 = vadd.xlane.f32.xlu0 %v639_v4 }
  0xc9   :  { %v387_v42 = vsel %vm249_vm1, %v355_v35, %v222_v26  ;;  %v389_v43 = vsel %vm249_vm1, %v357_v38, %v224_v31 }
  0xca   :  { %v140_v48 = vpop.xlane.xlu0 %139  ;;  %v144_v49 = vpop.xlane.xlu1 %143  ;;  %v2974_v50 = vsub.f32 %v2707_v9, %v387_v42  ;;  %v2977_v53 = vsub.f32 %v2709_v10, %v389_v43 }
  0xcb   :  { %v194_v54 = vmul.f32 0.015625, %v140_v48  ;;  %v196_v55 = vmul.f32 0.015625, %v144_v49 }
  0xcc   :  { %676 = vadd.xlane.f32.xlu1 %v641_v56  ;;  %v451_v59 = vmul.f32 %v2974_v50, %v2974_v50  ;;  %v453_v60 = vmul.f32 %v2977_v53, %v2977_v53 }
  0xcd   :  { %v226_v61 = vsel %vm85_vm0, %v194_v54, 0.0  ;;  %v228_v9 = vsel %vm85_vm0, %v196_v55, 0.0 }
  0xce   :  { %v305_v10 = vpop.xlane.xlu0 %304  ;;  %v309_v62 = vpop.xlane.xlu1 %308  ;;  %v483_v1 = vsel %vm85_vm0, %v451_v59, 0.0  ;;  %v485_v6 = vsel %vm85_vm0, %v453_v60, 0.0  ;;  %v643_v23 = vsel %vm249_vm1, %v451_v59, 0.0  ;;  %v645_v34 = vsel %vm249_vm1, %v453_v60, 0.0 }
  0xcf   :  { %v359_v7 = vmul.f32 0.015625, %v305_v10  ;;  %v361_v12 = vmul.f32 0.015625, %v309_v62  ;;  %520 = vadd.xlane.f32.xlu0 %v483_v1 }
  0xd0   :  { %524 = vadd.xlane.f32.xlu1 %v485_v6 }
  0xd1   :  { %v391_v14 = vsel %vm249_vm1, %v359_v7, %v226_v61  ;;  %v393_v15 = vsel %vm249_vm1, %v361_v12, %v228_v9 }
  0xd2   :  { %v148_v19 = vpop.xlane.xlu0 %147  ;;  %v152_v22 = vpop.xlane.xlu1 %151  ;;  %v3000_v3 = vsub.f32 %v2717_v13, %v391_v14  ;;  %v3003_v26 = vsub.f32 %v2725_v16, %v393_v15 }
  0xd3   :  { %v198_v31 = vmul.f32 0.015625, %v148_v19  ;;  %v200_v33 = vmul.f32 0.015625, %v152_v22  ;;  %680 = vadd.xlane.f32.xlu0 %v643_v23 }
  0xd4   :  { %684 = vadd.xlane.f32.xlu1 %v645_v34  ;;  %v455_v35 = vmul.f32 %v3000_v3, %v3000_v3  ;;  %v457_v38 = vmul.f32 %v3003_v26, %v3003_v26 }
  0xd5   :  { %v230_v13 = vsel %vm85_vm0, %v198_v31, 0.0  ;;  %v232_v16 = vsel %vm85_vm0, %v200_v33, 0.0 }
  0xd6   :  { %v313_v41 = vpop.xlane.xlu0 %312  ;;  %v317_v4 = vpop.xlane.xlu1 %316  ;;  %v487_v42 = vsel %vm85_vm0, %v455_v35, 0.0  ;;  %v489_v43 = vsel %vm85_vm0, %v457_v38, 0.0  ;;  %v647_v54 = vsel %vm249_vm1, %v455_v35, 0.0  ;;  %v649_v55 = vsel %vm249_vm1, %v457_v38, 0.0 }
  0xd7   :  { %v363_v48 = vmul.f32 0.015625, %v313_v41  ;;  %v365_v49 = vmul.f32 0.015625, %v317_v4  ;;  %528 = vadd.xlane.f32.xlu0 %v487_v42 }
  0xd8   :  { %532 = vadd.xlane.f32.xlu1 %v489_v43 }
  0xd9   :  { %v395_v56 = vsel %vm249_vm1, %v363_v48, %v230_v13  ;;  %v397_v59 = vsel %vm249_vm1, %v365_v49, %v232_v16 }
  0xda   :  { %v156_v60 = vpop.xlane.xlu0 %155  ;;  %v160_v61 = vpop.xlane.xlu1 %159  ;;  %v3028_v9 = vsub.f32 %v2727_v17, %v395_v56  ;;  %v3031_v10 = vsub.f32 %v2729_v18, %v397_v59 }
  0xdb   :  { %v202_v62 = vmul.f32 0.015625, %v156_v60  ;;  %v204_v1 = vmul.f32 0.015625, %v160_v61  ;;  %688 = vadd.xlane.f32.xlu0 %v647_v54 }
  0xdc   :  { %692 = vadd.xlane.f32.xlu1 %v649_v55  ;;  %v459_v6 = vmul.f32 %v3028_v9, %v3028_v9  ;;  %v461_v7 = vmul.f32 %v3031_v10, %v3031_v10 }
  0xdd   :  { %v234_v12 = vsel %vm85_vm0, %v202_v62, 0.0  ;;  %v236_v17 = vsel %vm85_vm0, %v204_v1, 0.0 }
  0xde   :  { %v321_v14 = vpop.xlane.xlu0 %320  ;;  %v325_v15 = vpop.xlane.xlu1 %324  ;;  %v491_v18 = vsel %vm85_vm0, %v459_v6, 0.0  ;;  %v493_v19 = vsel %vm85_vm0, %v461_v7, 0.0  ;;  %v651_v31 = vsel %vm249_vm1, %v459_v6, 0.0  ;;  %v653_v33 = vsel %vm249_vm1, %v461_v7, 0.0 }
  0xdf   :  { %v367_v22 = vmul.f32 0.015625, %v321_v14  ;;  %v369_v23 = vmul.f32 0.015625, %v325_v15  ;;  %536 = vadd.xlane.f32.xlu0 %v491_v18 }
  0xe0   :  { %540 = vadd.xlane.f32.xlu1 %v493_v19  ;;  %v282_v19 = vsel %vm249_vm1, %v2931_v44, 0.0 }
  0xe1   :  { %v399_v34 = vsel %vm249_vm1, %v367_v22, %v234_v12  ;;  %v401_v35 = vsel %vm249_vm1, %v369_v23, %v236_v17  ;;  %v284_v23 = vsel %vm249_vm1, %v2933_v47, 0.0 }
  0xe2   :  { %v164_v38 = vpop.xlane.xlu0 %163  ;;  %v168_v13 = vpop.xlane.xlu1 %167  ;;  %v3054_v16 = vsub.f32 %v2746_v24, %v399_v34  ;;  %v3057_v41 = vsub.f32 %v2757_v28, %v401_v35 }
  0xe3   :  { %696 = vadd.xlane.f32.xlu0 %v651_v31  ;;  %v206_v4 = vmul.f32 0.015625, %v164_v38  ;;  %v208_v42 = vmul.f32 0.015625, %v168_v13 }
  0xe4   :  { %700 = vadd.xlane.f32.xlu1 %v653_v33  ;;  %v463_v43 = vmul.f32 %v3054_v16, %v3054_v16  ;;  %v465_v48 = vmul.f32 %v3057_v41, %v3057_v41 }
  0xe5   :  { %v238_v49 = vsel %vm85_vm0, %v206_v4, 0.0  ;;  %v240_v24 = vsel %vm85_vm0, %v208_v42, 0.0 }
  0xe6   :  { %v495_v28 = vsel %vm85_vm0, %v463_v43, 0.0  ;;  %v497_v54 = vsel %vm85_vm0, %v465_v48, 0.0  ;;  %v329_v55 = vpop.xlane.xlu0 %328  ;;  %v333_v56 = vpop.xlane.xlu1 %332  ;;  %v655_v61 = vsel %vm249_vm1, %v463_v43, 0.0  ;;  %v657_v62 = vsel %vm249_vm1, %v465_v48, 0.0 }
  0xe7   :  { %544 = vadd.xlane.f32.xlu0 %v495_v28  ;;  %v371_v59 = vmul.f32 0.015625, %v329_v55  ;;  %v373_v60 = vmul.f32 0.015625, %v333_v56 }
  0xe8   :  { %548 = vadd.xlane.f32.xlu1 %v497_v54 }
  0xe9   :  { %v403_v1 = vsel %vm249_vm1, %v371_v59, %v238_v49  ;;  %v405_v6 = vsel %vm249_vm1, %v373_v60, %v240_v24 }
  0xea   :  { %v172_v7 = vpop.xlane.xlu0 %171  ;;  %v176_v12 = vpop.xlane.xlu1 %175  ;;  %v3080_v17 = vsub.f32 %v2762_v30, %v403_v1  ;;  %v3083_v14 = vsub.f32 %v2767_v32, %v405_v6 }
  0xeb   :  { %704 = vadd.xlane.f32.xlu0 %v655_v61  ;;  %v210_v15 = vmul.f32 0.015625, %v172_v7  ;;  %v212_v18 = vmul.f32 0.015625, %v176_v12 }
  0xec   :  { %708 = vadd.xlane.f32.xlu1 %v657_v62  ;;  %v467_v22 = vmul.f32 %v3080_v17, %v3080_v17  ;;  %v469_v30 = vmul.f32 %v3083_v14, %v3083_v14 }
  0xed   :  { %v242_v32 = vsel %vm85_vm0, %v210_v15, 0.0  ;;  %v244_v31 = vsel %vm85_vm0, %v212_v18, 0.0 }
  0xee   :  { %v337_v33 = vpop.xlane.xlu0 %336  ;;  %v341_v34 = vpop.xlane.xlu1 %340  ;;  %v499_v38 = vsel %vm85_vm0, %v467_v22, 0.0  ;;  %v501_v47 = vsel %vm85_vm0, %v469_v30, 0.0  ;;  %v659_v54 = vsel %vm249_vm1, %v467_v22, 0.0  ;;  %v661_v56 = vsel %vm249_vm1, %v469_v30, 0.0 }
  0xef   :  { %342 = vadd.xlane.f32.xlu0 %v282_v19  ;;  %v375_v44 = vmul.f32 0.015625, %v337_v33  ;;  %v377_v35 = vmul.f32 0.015625, %v341_v34 }
  0xf0   :  { %346 = vadd.xlane.f32.xlu1 %v284_v23 }
  0xf1   :  { %v407_v13 = vsel %vm249_vm1, %v375_v44, %v242_v32  ;;  %v409_v4 = vsel %vm249_vm1, %v377_v35, %v244_v31 }
  0xf2   :  { %v180_v42 = vpop.xlane.xlu0 %179  ;;  %v184_v43 = vpop.xlane.xlu1 %183  ;;  %v3108_v48 = vsub.f32 %v2787_v39, %v407_v13  ;;  %v3111_v49 = vsub.f32 %v2789_v40, %v409_v4 }
  0xf3   :  { %552 = vadd.xlane.f32.xlu0 %v499_v38  ;;  %v214_v24 = vmul.f32 0.015625, %v180_v42  ;;  %v216_v28 = vmul.f32 0.015625, %v184_v43 }
  0xf4   :  { %556 = vadd.xlane.f32.xlu1 %v501_v47  ;;  %v471_v55 = vmul.f32 %v3108_v48, %v3108_v48  ;;  %v473_v39 = vmul.f32 %v3111_v49, %v3111_v49 }
  0xf5   :  { %v246_v40 = vsel %vm85_vm0, %v214_v24, 0.0  ;;  %v248_v59 = vsel %vm85_vm0, %v216_v28, 0.0 }
  0xf6   :  { %v345_v60 = vpop.xlane.xlu0 %344  ;;  %v349_v61 = vpop.xlane.xlu1 %348  ;;  %v503_v6 = vsel %vm85_vm0, %v471_v55, 0.0  ;;  %v505_v7 = vsel %vm85_vm0, %v473_v39, 0.0  ;;  %v663_v31 = vsel %vm249_vm1, %v471_v55, 0.0  ;;  %v665_v34 = vsel %vm249_vm1, %v473_v39, 0.0 }
  0xf7   :  { %712 = vadd.xlane.f32.xlu0 %v659_v54  ;;  %v379_v62 = vmul.f32 0.015625, %v345_v60  ;;  %v381_v1 = vmul.f32 0.015625, %v349_v61 }
  0xf8   :  { %716 = vadd.xlane.f32.xlu1 %v661_v56 }
  0xf9   :  { %v411_v12 = vsel %vm249_vm1, %v379_v62, %v246_v40  ;;  %v413_v15 = vsel %vm249_vm1, %v381_v1, %v248_v59 }
  0xfa   :  { %v122_v18 = vpop.xlane.xlu0 %121  ;;  %v126_v19 = vpop.xlane.xlu1 %125  ;;  %v3134_v22 = vsub.f32 %v2803_v45, %v411_v12  ;;  %v3137_v23 = vsub.f32 %v2805_v46, %v413_v15 }
  0xfb   :  { %560 = vadd.xlane.f32.xlu0 %v503_v6  ;;  %v185_v30 = vmul.f32 0.015625, %v122_v18  ;;  %v187_v32 = vmul.f32 0.015625, %v126_v19 }
  0xfc   :  { %564 = vadd.xlane.f32.xlu1 %v505_v7  ;;  %v475_v33 = vmul.f32 %v3134_v22, %v3134_v22  ;;  %v477_v45 = vmul.f32 %v3137_v23, %v3137_v23 }
  0xfd   :  { %v217_v46 = vsel %vm85_vm0, %v185_v30, 0.0  ;;  %v219_v44 = vsel %vm85_vm0, %v187_v32, 0.0 }
  0xfe   :  { %v287_v35 = vpop.xlane.xlu0 %286  ;;  %v291_v38 = vpop.xlane.xlu1 %290  ;;  %v507_v4 = vsel %vm85_vm0, %v475_v33, 0.0  ;;  %v509_v42 = vsel %vm85_vm0, %v477_v45, 0.0  ;;  %v667_v59 = vsel %vm249_vm1, %v475_v33, 0.0  ;;  %v669_v61 = vsel %vm249_vm1, %v477_v45, 0.0 }
  0xff   :  { %720 = vadd.xlane.f32.xlu0 %v663_v31  ;;  %v350_v47 = vmul.f32 0.015625, %v287_v35  ;;  %v352_v13 = vmul.f32 0.015625, %v291_v38 }
 0x100   :  { %724 = vadd.xlane.f32.xlu1 %v665_v34 }
 0x101   :  { %v382_v43 = vsel %vm249_vm1, %v350_v47, %v217_v46  ;;  %v384_v24 = vsel %vm249_vm1, %v352_v13, %v219_v44 }
 0x102   :  { %v130_v28 = vpop.xlane.xlu0 %129  ;;  %v134_v54 = vpop.xlane.xlu1 %133  ;;  %v3160_v55 = vsub.f32 %v2819_v51, %v382_v43  ;;  %v3163_v56 = vsub.f32 %v2821_v52, %v384_v24 }
 0x103   :  { %568 = vadd.xlane.f32.xlu0 %v507_v4  ;;  %v189_v39 = vmul.f32 0.015625, %v130_v28  ;;  %v191_v40 = vmul.f32 0.015625, %v134_v54 }
 0x104   :  { %572 = vadd.xlane.f32.xlu1 %v509_v42  ;;  %v446_v60 = vmul.f32 %v3160_v55, %v3160_v55  ;;  %v448_v51 = vmul.f32 %v3163_v56, %v3163_v56 }
 0x105   :  { %v221_v52 = vsel %vm85_vm0, %v189_v39, 0.0  ;;  %v223_v62 = vsel %vm85_vm0, %v191_v40, 0.0 }
 0x106   :  { %v295_v1 = vpop.xlane.xlu0 %294  ;;  %v299_v6 = vpop.xlane.xlu1 %298  ;;  %v478_v15 = vsel %vm85_vm0, %v446_v60, 0.0  ;;  %v480_v30 = vsel %vm85_vm0, %v448_v51, 0.0  ;;  %v638_v44 = vsel %vm249_vm1, %v446_v60, 0.0  ;;  %v640_v38 = vsel %vm249_vm1, %v448_v51, 0.0 }
 0x107   :  { %728 = vadd.xlane.f32.xlu0 %v667_v59  ;;  %v354_v7 = vmul.f32 0.015625, %v295_v1  ;;  %v356_v12 = vmul.f32 0.015625, %v299_v6 }
 0x108   :  { %732 = vadd.xlane.f32.xlu1 %v669_v61 }
 0x109   :  { %v386_v18 = vsel %vm249_vm1, %v354_v7, %v221_v52  ;;  %v388_v19 = vsel %vm249_vm1, %v356_v12, %v223_v62 }
 0x10a   :  { %v138_v32 = vpop.xlane.xlu0 %137  ;;  %v142_v31 = vpop.xlane.xlu1 %141  ;;  %v3186_v33 = vsub.f32 %v2835_v57, %v386_v18  ;;  %v3189_v34 = vsub.f32 %v2837_v58, %v388_v19 }
 0x10b   :  { %510 = vadd.xlane.f32.xlu0 %v478_v15  ;;  %v193_v45 = vmul.f32 0.015625, %v138_v32  ;;  %v195_v46 = vmul.f32 0.015625, %v142_v31 }
 0x10c   :  { %514 = vadd.xlane.f32.xlu1 %v480_v30  ;;  %v450_v35 = vmul.f32 %v3186_v33, %v3186_v33  ;;  %v452_v57 = vmul.f32 %v3189_v34, %v3189_v34 }
 0x10d   :  { %v225_v58 = vsel %vm85_vm0, %v193_v45, 0.0  ;;  %v227_v47 = vsel %vm85_vm0, %v195_v46, 0.0 }
 0x10e   :  { %v303_v13 = vpop.xlane.xlu0 %302  ;;  %v307_v4 = vpop.xlane.xlu1 %306  ;;  %v482_v24 = vsel %vm85_vm0, %v450_v35, 0.0  ;;  %v484_v39 = vsel %vm85_vm0, %v452_v57, 0.0  ;;  %v642_v62 = vsel %vm249_vm1, %v450_v35, 0.0  ;;  %v644_v6 = vsel %vm249_vm1, %v452_v57, 0.0 }
 0x10f   :  { %670 = vadd.xlane.f32.xlu0 %v638_v44  ;;  %v358_v42 = vmul.f32 0.015625, %v303_v13  ;;  %v360_v43 = vmul.f32 0.015625, %v307_v4 }
 0x110   :  { %674 = vadd.xlane.f32.xlu1 %v640_v38 }
 0x111   :  { %v390_v28 = vsel %vm249_vm1, %v358_v42, %v225_v58  ;;  %v392_v54 = vsel %vm249_vm1, %v360_v43, %v227_v47 }
 0x112   :  { %v146_v40 = vpop.xlane.xlu0 %145  ;;  %v150_v59 = vpop.xlane.xlu1 %149  ;;  %v3212_v60 = vsub.f32 %v2851_v63, %v390_v28  ;;  %v3215_v61 = vsub.f32 %v2853_v0, %v392_v54 }
 0x113   :  { %518 = vadd.xlane.f32.xlu0 %v482_v24  ;;  %v197_v51 = vmul.f32 0.015625, %v146_v40  ;;  %v199_v52 = vmul.f32 0.015625, %v150_v59 }
 0x114   :  { %522 = vadd.xlane.f32.xlu1 %v484_v39  ;;  %v454_v1 = vmul.f32 %v3212_v60, %v3212_v60  ;;  %v456_v63 = vmul.f32 %v3215_v61, %v3215_v61 }
 0x115   :  { %v229_v0 = vsel %vm85_vm0, %v197_v51, 0.0  ;;  %v231_v7 = vsel %vm85_vm0, %v199_v52, 0.0 }
 0x116   :  { %v311_v12 = vpop.xlane.xlu0 %310  ;;  %v315_v15 = vpop.xlane.xlu1 %314  ;;  %v486_v30 = vsel %vm85_vm0, %v454_v1, 0.0  ;;  %v488_v45 = vsel %vm85_vm0, %v456_v63, 0.0  ;;  %v646_v47 = vsel %vm249_vm1, %v454_v1, 0.0  ;;  %v648_v4 = vsel %vm249_vm1, %v456_v63, 0.0 }
 0x117   :  { %678 = vadd.xlane.f32.xlu0 %v642_v62  ;;  %v362_v18 = vmul.f32 0.015625, %v311_v12  ;;  %v364_v19 = vmul.f32 0.015625, %v315_v15 }
 0x118   :  { %682 = vadd.xlane.f32.xlu1 %v644_v6 }
 0x119   :  { %v394_v32 = vsel %vm249_vm1, %v362_v18, %v229_v0  ;;  %v396_v31 = vsel %vm249_vm1, %v364_v19, %v231_v7 }
 0x11a   :  { %v154_v46 = vpop.xlane.xlu0 %153  ;;  %v158_v44 = vpop.xlane.xlu1 %157  ;;  %v3238_v35 = vsub.f32 %v2867_v8, %v394_v32  ;;  %v3241_v38 = vsub.f32 %v2869_v11, %v396_v31 }
 0x11b   :  { %526 = vadd.xlane.f32.xlu0 %v486_v30  ;;  %v201_v57 = vmul.f32 0.015625, %v154_v46  ;;  %v203_v58 = vmul.f32 0.015625, %v158_v44 }
 0x11c   :  { %530 = vadd.xlane.f32.xlu1 %v488_v45  ;;  %v458_v13 = vmul.f32 %v3238_v35, %v3238_v35  ;;  %v460_v8 = vmul.f32 %v3241_v38, %v3241_v38 }
 0x11d   :  { %v233_v11 = vsel %vm85_vm0, %v201_v57, 0.0  ;;  %v235_v42 = vsel %vm85_vm0, %v203_v58, 0.0 }
 0x11e   :  { %v319_v43 = vpop.xlane.xlu0 %318  ;;  %v323_v24 = vpop.xlane.xlu1 %322  ;;  %v490_v39 = vsel %vm85_vm0, %v458_v13, 0.0  ;;  %v492_v51 = vsel %vm85_vm0, %v460_v8, 0.0  ;;  %v650_v7 = vsel %vm249_vm1, %v458_v13, 0.0  ;;  %v652_v15 = vsel %vm249_vm1, %v460_v8, 0.0 }
 0x11f   :  { %686 = vadd.xlane.f32.xlu0 %v646_v47  ;;  %v366_v28 = vmul.f32 0.015625, %v319_v43  ;;  %v368_v54 = vmul.f32 0.015625, %v323_v24 }
 0x120   :  { %690 = vadd.xlane.f32.xlu1 %v648_v4 }
 0x121   :  { %v398_v40 = vsel %vm249_vm1, %v366_v28, %v233_v11  ;;  %v400_v59 = vsel %vm249_vm1, %v368_v54, %v235_v42 }
 0x122   :  { %v162_v52 = vpop.xlane.xlu0 %161  ;;  %v166_v62 = vpop.xlane.xlu1 %165  ;;  %v3264_v1 = vsub.f32 %v2883_v20, %v398_v40  ;;  %v3267_v6 = vsub.f32 %v2885_v21, %v400_v59 }
 0x123   :  { %534 = vadd.xlane.f32.xlu0 %v490_v39  ;;  %v205_v63 = vmul.f32 0.015625, %v162_v52  ;;  %v207_v0 = vmul.f32 0.015625, %v166_v62 }
 0x124   :  { %538 = vadd.xlane.f32.xlu1 %v492_v51  ;;  %v462_v12 = vmul.f32 %v3264_v1, %v3264_v1  ;;  %v464_v20 = vmul.f32 %v3267_v6, %v3267_v6 }
 0x125   :  { %v237_v21 = vsel %vm85_vm0, %v205_v63, 0.0  ;;  %v239_v18 = vsel %vm85_vm0, %v207_v0, 0.0 }
 0x126   :  { %v327_v19 = vpop.xlane.xlu0 %326  ;;  %v331_v30 = vpop.xlane.xlu1 %330  ;;  %v494_v45 = vsel %vm85_vm0, %v462_v12, 0.0  ;;  %v496_v57 = vsel %vm85_vm0, %v464_v20, 0.0  ;;  %v654_v42 = vsel %vm249_vm1, %v462_v12, 0.0  ;;  %v656_v24 = vsel %vm249_vm1, %v464_v20, 0.0 }
 0x127   :  { %694 = vadd.xlane.f32.xlu0 %v650_v7  ;;  %v370_v32 = vmul.f32 0.015625, %v327_v19  ;;  %v372_v31 = vmul.f32 0.015625, %v331_v30 }
 0x128   :  { %698 = vadd.xlane.f32.xlu1 %v652_v15 }
 0x129   :  { %v402_v46 = vsel %vm249_vm1, %v370_v32, %v237_v21  ;;  %v404_v44 = vsel %vm249_vm1, %v372_v31, %v239_v18 }
 0x12a   :  { %v174_v58 = vpop.xlane.xlu1 %173  ;;  %v170_v47 = vpop.xlane.xlu0 %169  ;;  %v3290_v13 = vsub.f32 %v2899_v27, %v402_v46  ;;  %v3293_v4 = vsub.f32 %v2901_v29, %v404_v44 }
 0x12b   :  { %542 = vadd.xlane.f32.xlu0 %v494_v45  ;;  %v211_v8 = vmul.f32 0.015625, %v174_v58  ;;  %v209_v11 = vmul.f32 0.015625, %v170_v47 }
 0x12c   :  { %546 = vadd.xlane.f32.xlu1 %v496_v57  ;;  %v466_v43 = vmul.f32 %v3290_v13, %v3290_v13  ;;  %v468_v27 = vmul.f32 %v3293_v4, %v3293_v4 }
 0x12d   :  { %v243_v29 = vsel %vm85_vm0, %v211_v8, 0.0  ;;  %v241_v28 = vsel %vm85_vm0, %v209_v11, 0.0 }
 0x12e   :  { %v339_v54 = vpop.xlane.xlu1 %338  ;;  %v335_v39 = vpop.xlane.xlu0 %334  ;;  %v498_v51 = vsel %vm85_vm0, %v466_v43, 0.0  ;;  %v500_v62 = vsel %vm85_vm0, %v468_v27, 0.0  ;;  %v658_v12 = vsel %vm249_vm1, %v466_v43, 0.0  ;;  %v660_v20 = vsel %vm249_vm1, %v468_v27, 0.0  ;;  %v2444_v43 = vld [vmem:[#allocation7 + $0x40] sm:$0xff]  }
 0x12f   :  { %702 = vadd.xlane.f32.xlu0 %v654_v42  ;;  %v376_v40 = vmul.f32 0.015625, %v339_v54  ;;  %v374_v59 = vmul.f32 0.015625, %v335_v39  ;;  %v2445_v27 = vld [vmem:[#allocation7] sm:$0xff]   ;;  %2264 = vmatprep.subr.bf16.mxu0 %v2444_v43 }
 0x130   :  { %706 = vadd.xlane.f32.xlu1 %v656_v24  ;;  %2265 = vmatpush3.bf16.msra.mxu0 %v2445_v27  ;;  %v2454_v27 = vld [vmem:[#allocation7 + $0x58] sm:$0xff]  }
 0x131   :  { %v408_v52 = vsel %vm249_vm1, %v376_v40, %v243_v29  ;;  %v406_v63 = vsel %vm249_vm1, %v374_v59, %v241_v28 }
 0x132   :  { %v3316_v0 = vsub.f32 %v2915_v36, %v408_v52  ;;  %v3319_v7 = vsub.f32 %v2917_v37, %v406_v63  ;;  %v3337_v30 = vpop.xlane.xlu0 %177  ;;  %v3339_v32 = vpop.xlane.xlu1 %181  ;;  %v2447_v52 = vld [vmem:[#allocation7 + $0xc0] sm:$0xff]  }
 0x133   :  { %550 = vadd.xlane.f32.xlu0 %v498_v51  ;;  %v2446_v51 = vld [vmem:[#allocation7 + $0x48] sm:$0xff]   ;;  %v2449_v63 = vld [vmem:[#allocation7 + $0x80] sm:$0xff]   ;;  %2328 = vmatprep.subr.bf16.mxu1 %v2447_v52 }
 0x134   :  { %554 = vadd.xlane.f32.xlu1 %v500_v62  ;;  %v470_v15 = vmul.f32 %v3319_v7, %v3319_v7  ;;  %v472_v21 = vmul.f32 %v3316_v0, %v3316_v0  ;;  %v2448_v62 = vld [vmem:[#allocation7 + $0x8] sm:$0xff]   ;;  %2266 = vmatprep.subr.bf16.mxu0 %v2446_v51 }
 0x135   :  { %2267 = vmatpush3.bf16.msra.mxu0 %v2448_v62  ;;  %2329 = vmatpush3.bf16.msra.mxu1 %v2449_v63  ;;  %v2459_v63 = vld [vmem:[#allocation7 + $0xd8] sm:$0xff]  }
 0x136   :  { %v502_v36 = vsel %vm85_vm0, %v470_v15, 0.0  ;;  %v504_v37 = vsel %vm85_vm0, %v472_v21, 0.0  ;;  %v662_v18 = vsel %vm249_vm1, %v470_v15, 0.0  ;;  %v664_v19 = vsel %vm249_vm1, %v472_v21, 0.0 }
 0x137   :  { %710 = vadd.xlane.f32.xlu0 %v658_v12 }
 0x138   :  { %714 = vadd.xlane.f32.xlu1 %v660_v20 }
 0x13b   :  { %558 = vadd.xlane.f32.xlu0 %v502_v36 }
 0x13c   :  { %562 = vadd.xlane.f32.xlu1 %v504_v37  ;;  %v2450_v37 = vld [vmem:[#allocation7 + $0x50] sm:$0xff]  }
 0x13d   :  { %2268 = vmatprep.subr.bf16.mxu0 %v2450_v37  ;;  %v1180_v37 = vld [vmem:[#allocation2 + $0x11] sm:$0xff] }
 0x140   :  { %718 = vadd.xlane.f32.xlu1 %v662_v18  ;;  %v2451_v18 = vld [vmem:[#allocation7 + $0xc8] sm:$0xff]  }
 0x141   :  { %2330 = vmatprep.subr.bf16.mxu1 %v2451_v18  ;;  %v2461_v18 = vld [vmem:[#allocation7 + $0x98] sm:$0xff]  }
 0x144   :  { %722 = vadd.xlane.f32.xlu1 %v664_v19 }
 0x151   :  { %v513_v31 = vpop.xlane.xlu0 %512 }
 0x152   :  { %v575_v45 = vmul.f32 0.015625, %v513_v31  ;;  %v2452_v31 = vld [vmem:[#allocation7 + $0x10] sm:$0xff]  }
 0x153   :  { %2269 = vmatpush3.bf16.msra.mxu0 %v2452_v31 }
 0x154   :  { %v607_v58 = vsel %vm85_vm0, %v575_v45, 0.0  ;;  %v2453_v45 = vld [vmem:[#allocation7 + $0x88] sm:$0xff]   ;;  %2270 = vmatprep.subr.bf16.mxu0 %v2454_v27  ;;  %v2463_v27 = vld [vmem:[#allocation7 + $0xe0] sm:$0xff]  }
 0x155   :  { %v517_v46 = vpop.xlane.xlu1 %516  ;;  %v673_v44 = vpop.xlane.xlu0 %672  ;;  %2331 = vmatpush3.bf16.msra.mxu1 %v2453_v45 }
 0x156   :  { %v735_v57 = vmul.f32 0.015625, %v673_v44  ;;  %v577_v47 = vmul.f32 0.015625, %v517_v46 }
 0x158   :  { %v767_v8 = vsel %vm249_vm1, %v735_v57, %v607_v58  ;;  %v609_v29 = vsel %vm85_vm0, %v577_v47, 0.0  ;;  %v3358_v57 = vld [vmem:[%s3952_s2] ss:$0 sm:$0xff] }
 0x159   :  { %v799_v11 = vadd.f32 1e-05, %v767_v8  ;;  %v677_v42 = vpop.xlane.xlu1 %676 }
 0x15a   :  { %v737_v24 = vmul.f32 0.015625, %v677_v42 }
 0x15b   :  { %2480 = vrsqrt.f32 %v799_v11 }
 0x15c   :  { %v769_v28 = vsel %vm249_vm1, %v737_v24, %v609_v29  ;;  %v521_v54 = vpop.xlane.xlu0 %520  ;;  %v2455_v29 = vld [vmem:[#allocation7 + $0xd0] sm:$0xff]  }
 0x15d   :  { %v801_v39 = vadd.f32 1e-05, %v769_v28  ;;  %v579_v40 = vmul.f32 0.015625, %v521_v54  ;;  %v525_v59 = vpop.xlane.xlu1 %524  ;;  %2332 = vmatprep.subr.bf16.mxu1 %v2455_v29  ;;  %v2464_v29 = vld [vmem:[#allocation7 + $0x28] sm:$0xff]  }
 0x15e   :  { %v581_v12 = vmul.f32 0.015625, %v525_v59  ;;  %v3366_v59 = vld [vmem:[%s3953_s3] ss:$0 sm:$0xff] }
 0x15f   :  { %2482 = vrsqrt.f32 %v801_v39  ;;  %v611_v15 = vsel %vm85_vm0, %v579_v40, 0.0  ;;  %v2456_v39 = vld [vmem:[#allocation7 + $0x18] sm:$0xff]   ;;  %v2457_v40 = vld [vmem:[#allocation7 + $0x90] sm:$0xff]  }
 0x160   :  { %v681_v20 = vpop.xlane.xlu0 %680  ;;  %v613_v46 = vsel %vm85_vm0, %v581_v12, 0.0  ;;  %2271 = vmatpush3.bf16.msra.mxu0 %v2456_v39  ;;  %2333 = vmatpush3.bf16.msra.mxu1 %v2457_v40  ;;  %v2460_v12 = vld [vmem:[#allocation7 + $0x20] sm:$0xff]  }
 0x161   :  { %v739_v21 = vmul.f32 0.015625, %v681_v20  ;;  %v685_v36 = vpop.xlane.xlu1 %684  ;;  %2334 = vmatprep.subr.bf16.mxu1 %v2459_v63  ;;  %v2465_v39 = vld [vmem:[#allocation7 + $0xa0] sm:$0xff]  }
 0x162   :  { %v741_v19 = vmul.f32 0.015625, %v685_v36 }
 0x163   :  { %v771_v44 = vsel %vm249_vm1, %v739_v21, %v611_v15 }
 0x164   :  { %v803_v58 = vadd.f32 1e-05, %v771_v44  ;;  %v773_v47 = vsel %vm249_vm1, %v741_v19, %v613_v46  ;;  %v529_v8 = vpop.xlane.xlu0 %528  ;;  %2335 = vmatpush3.bf16.msra.mxu1 %v2461_v18  ;;  %v2468_v18 = vld [vmem:[#allocation7 + $0x30] sm:$0xff]  }
 0x165   :  { %v2481_v11 = vpop.eup %2480  ;;  %v805_v42 = vadd.f32 1e-05, %v773_v47  ;;  %v583_v43 = vmul.f32 0.015625, %v529_v8  ;;  %v533_v24 = vpop.xlane.xlu1 %532  ;;  %2336 = vmatprep.subr.bf16.mxu1 %v2463_v27 }
 0x166   :  { %v863_v28 = vmul.f32 %v2481_v11, %v2946_v5  ;;  %2484 = vrsqrt.f32 %v803_v58  ;;  %v585_v54 = vmul.f32 0.015625, %v533_v24  ;;  %v2458_v5 = vld [vmem:[#allocation7 + $0x60] sm:$0xff]   ;;  %v2462_v24 = vld [vmem:[#allocation7 + $0x68] sm:$0xff]  }
 0x167   :  { %2486 = vrsqrt.f32 %v805_v42  ;;  %v615_v52 = vsel %vm85_vm0, %v583_v43, 0.0  ;;  %2272 = vmatprep.subr.bf16.mxu0 %v2458_v5 }
 0x168   :  { %v902_v51 = vmul.f32 %v3358_v57, %v863_v28  ;;  %v689_v62 = vpop.xlane.xlu0 %688  ;;  %v617_v20 = vsel %vm85_vm0, %v585_v54, 0.0  ;;  %2273 = vmatpush3.bf16.msra.mxu0 %v2460_v12  ;;  %2337 = vmatpush3.bf16.msra.mxu1 %v2465_v39 }
 0x169   :  { %v2483_v15 = vpop.eup %2482  ;;  %v743_v21 = vmul.f32 0.015625, %v689_v62  ;;  %v693_v36 = vpop.xlane.xlu1 %692  ;;  %2274 = vmatprep.subr.bf16.mxu0 %v2462_v24  ;;  %v2472_v24 = vld [vmem:[#allocation7 + $0x38] sm:$0xff]  }
 0x16a   :  { %v3374_v19 = vadd.f32 %v3366_v59, %v902_v51  ;;  %v865_v31 = vmul.f32 %v2483_v15, %v2957_v25  ;;  %v745_v45 = vmul.f32 0.015625, %v693_v36 }
 0x16b   :  { %v775_v46 = vsel %vm249_vm1, %v743_v21, %v615_v52  ;;  %v2467_v21 = vld [vmem:[#allocation7 + $0xe8] sm:$0xff]  }
 0x16c   :  { %1018 = vst [vmem:[#allocation2 + $0x31] sm:$0xff] %v3374_v19  ;;  %v904_v44 = vmul.f32 %v3358_v57, %v865_v31  ;;  %v807_v58 = vadd.f32 1e-05, %v775_v46  ;;  %v777_v47 = vsel %vm249_vm1, %v745_v45, %v617_v20  ;;  %v537_v8 = vpop.xlane.xlu0 %536  ;;  %v1196_v11 = vpack.c.bf16 %v3374_v19, %v1180_v37  ;;  %2275 = vmatpush3.bf16.msra.mxu0 %v2464_v29  ;;  %v2466_v20 = vld [vmem:[#allocation7 + $0x70] sm:$0xff]   ;;  %v2469_v31 = vld [vmem:[#allocation7 + $0xa8] sm:$0xff]  }
 0x16d   :  { %v809_v25 = vadd.f32 1e-05, %v777_v47  ;;  %v587_v42 = vmul.f32 0.015625, %v537_v8  ;;  %v541_v43 = vpop.xlane.xlu1 %540  ;;  %2276 = vmatprep.subr.bf16.mxu0 %v2466_v20  ;;  %2338 = vmatprep.subr.bf16.mxu1 %v2467_v21 }
 0x16e   :  { %v3385_v28 = vadd.f32 %v3366_v59, %v904_v44  ;;  %2488 = vrsqrt.f32 %v807_v58  ;;  %v589_v54 = vmul.f32 0.015625, %v541_v43  ;;  %1212 = vrot.lane.b32.xlu0 %v1196_v11, %s2624_s0  ;;  %2339 = vmatpush3.bf16.msra.mxu1 %v2469_v31  ;;  %v2471_v43 = vld [vmem:[#allocation7 + $0xf0] sm:$0xff]  }
 0x16f   :  { %2490 = vrsqrt.f32 %v809_v25  ;;  %v619_v51 = vsel %vm85_vm0, %v587_v42, 0.0  ;;  %v2470_v42 = vld [vmem:[#allocation7 + $0x78] sm:$0xff]   ;;  %2340 = vmatprep.subr.bf16.mxu1 %v2471_v43 }
 0x170   :  { %v2485_v40 = vpop.eup %2484  ;;  %1020 = vst [vmem:[#allocation2 + $0x51] sm:$0xff] %v3385_v28  ;;  %v697_v52 = vpop.xlane.xlu0 %696  ;;  %v621_v63 = vsel %vm85_vm0, %v589_v54, 0.0  ;;  %2277 = vmatpush3.bf16.msra.mxu0 %v2468_v18  ;;  %v2473_v54 = vld [vmem:[#allocation7 + $0xb0] sm:$0xff]  }
 0x171   :  { %v2487_v62 = vpop.eup %2486  ;;  %v867_v5 = vmul.f32 %v2485_v40, %v2974_v50  ;;  %v747_v12 = vmul.f32 0.015625, %v697_v52  ;;  %v701_v15 = vpop.xlane.xlu1 %700  ;;  %2278 = vmatprep.subr.bf16.mxu0 %v2470_v42 }
 0x172   :  { %v869_v36 = vmul.f32 %v2487_v62, %v2977_v53  ;;  %v749_v37 = vmul.f32 0.015625, %v701_v15  ;;  %1147 = vrot.lane.b32.xlu0 %v1196_v11, %s2624_s0  ;;  %2341 = vmatpush3.bf16.msra.mxu1 %v2473_v54 }
 0x173   :  { %v906_v45 = vmul.f32 %v3358_v57, %v867_v5  ;;  %v779_v46 = vsel %vm249_vm1, %v747_v12, %v619_v51  ;;  %v1341_v39 = vld [vmem:[#allocation2 + $0x30] sm:$0xff] }
 0x174   :  { %v908_v50 = vmul.f32 %v3358_v57, %v869_v36  ;;  %v811_v44 = vadd.f32 1e-05, %v779_v46  ;;  %v781_v58 = vsel %vm249_vm1, %v749_v37, %v621_v63  ;;  %v545_v47 = vpop.xlane.xlu0 %544  ;;  %2279 = vmatpush3.bf16.msra.mxu0 %v2472_v24  ;;  %v1050_v36 = vld [vmem:[#allocation2 + $0x10] sm:$0xff]  ;;  %v2474_v37 = vld [vmem:[#allocation7 + $0xf8] sm:$0xff]  }
 0x175   :  { %v3403_v53 = vadd.f32 %v3366_v59, %v906_v45  ;;  %v813_v8 = vadd.f32 1e-05, %v781_v58  ;;  %v591_v11 = vmul.f32 0.015625, %v545_v47  ;;  %v549_v25 = vpop.xlane.xlu1 %548  ;;  %v2475_v45 = vld [vmem:[#allocation7 + $0xb8] sm:$0xff]   ;;  %2342 = vmatprep.subr.bf16.mxu1 %v2474_v37 }
 0x176   :  { %v3406_v27 = vadd.f32 %v3366_v59, %v908_v50  ;;  %2492 = vrsqrt.f32 %v811_v44  ;;  %v593_v29 = vmul.f32 0.015625, %v549_v25  ;;  %2343 = vmatpush3.bf16.msra.mxu1 %v2475_v45 }
 0x177   :  { %1022 = vst [vmem:[#allocation2 + $0x71] sm:$0xff] %v3403_v53  ;;  %2494 = vrsqrt.f32 %v813_v8  ;;  %v3409_v40 = vld [vmem:[#allocation2 + $0x50] sm:$0xff]  ;;  %v623_v52 = vsel %vm85_vm0, %v591_v11, 0.0  ;;  %v1066_v8 = vpack.c.bf16 %v1341_v39, %v1050_v36 }
 0x178   :  { %v2489_v51 = vpop.eup %2488  ;;  %1024 = vst [vmem:[#allocation2 + $0x91] sm:$0xff] %v3406_v27  ;;  %v705_v62 = vpop.xlane.xlu0 %704  ;;  %v1357_v5 = vpack.c.bf16 %v3409_v40, %v1341_v39  ;;  %v625_v15 = vsel %vm85_vm0, %v593_v29, 0.0 }
 0x179   :  { %v2491_v63 = vpop.eup %2490  ;;  %v871_v12 = vmul.f32 %v2489_v51, %v3000_v3  ;;  %v751_v20 = vmul.f32 0.015625, %v705_v62  ;;  %v709_v21 = vpop.xlane.xlu1 %708  ;;  %v1421_v51 = vpack.c.bf16 %v3385_v28, %v3374_v19 }
 0x17a   :  { %v873_v18 = vmul.f32 %v2491_v63, %v3003_v26  ;;  %v753_v31 = vmul.f32 0.015625, %v709_v21  ;;  %1373 = vrot.lane.b32.xlu1 %v1357_v5, %s2624_s0 }
 0x17b   :  { %v910_v46 = vmul.f32 %v3358_v57, %v871_v12  ;;  %v783_v50 = vsel %vm249_vm1, %v751_v20, %v623_v52 }
 0x17c   :  { %v912_v3 = vmul.f32 %v3358_v57, %v873_v18  ;;  %v815_v44 = vadd.f32 1e-05, %v783_v50  ;;  %v785_v58 = vsel %vm249_vm1, %v753_v31, %v625_v15  ;;  %v3426_v47 = vpop.xlane.xlu0 %342 }
 0x17d   :  { %v3429_v26 = vadd.f32 %v3366_v59, %v910_v46  ;;  %v817_v11 = vadd.f32 1e-05, %v785_v58  ;;  %v3431_v25 = vpop.xlane.xlu1 %346 }
 0x17e   :  { %v3434_v42 = vadd.f32 %v3366_v59, %v912_v3  ;;  %2496 = vrsqrt.f32 %v815_v44  ;;  %1082 = vrot.lane.b32.xlu1 %v1066_v8, %s2624_s0  ;;  %v1343_v43 = vld [vmem:[#allocation2 + $0x70] sm:$0xff] }
 0x17f   :  { %1026 = vst [vmem:[#allocation2 + $0xb1] sm:$0xff] %v3429_v26  ;;  %2498 = vrsqrt.f32 %v817_v11  ;;  %v3438_v24 = vld [vmem:[#allocation2 + $0x90] sm:$0xff]  ;;  %v3442_v29 = vpack.c.bf16 %v3429_v26, %v3406_v27  ;;  %v1067_v31 = vpack.c.bf16 %v1343_v43, %v3409_v40 }
 0x180   :  { %v2493_v54 = vpop.eup %2492  ;;  %1028 = vst [vmem:[#allocation2 + $0xd1] sm:$0xff] %v3434_v42  ;;  %v553_v39 = vpop.xlane.xlu0 %552  ;;  %v1358_v52 = vpack.c.bf16 %v3438_v24, %v1343_v43  ;;  %v1423_v62 = vpack.c.bf16 %v3434_v42, %v3429_v26 }
 0x181   :  { %v2495_v5 = vpop.eup %2494  ;;  %v875_v63 = vmul.f32 %v2493_v54, %v3028_v9  ;;  %v595_v12 = vmul.f32 0.015625, %v553_v39  ;;  %v557_v15 = vpop.xlane.xlu1 %556  ;;  %v3460_v9 = vpack.c.bf16 %v3403_v53, %v3385_v28  ;;  %v1422_v54 = vpack.c.bf16 %v3406_v27, %v3403_v53 }
 0x182   :  { %v877_v20 = vmul.f32 %v2495_v5, %v3031_v10  ;;  %v597_v21 = vmul.f32 0.015625, %v557_v15  ;;  %1437 = vrot.lane.b32.xlu1 %v1421_v51, %s2624_s0  ;;  %1375 = vrot.lane.b32.xlu0 %v1358_v52, %s2624_s0 }
 0x183   :  { %v914_v36 = vmul.f32 %v3358_v57, %v875_v63  ;;  %v627_v37 = vsel %vm85_vm0, %v595_v12, 0.0 }
 0x184   :  { %v916_v19 = vmul.f32 %v3358_v57, %v877_v20  ;;  %v713_v18 = vpop.xlane.xlu0 %712  ;;  %v629_v45 = vsel %vm85_vm0, %v597_v21, 0.0 }
 0x185   :  { %v3464_v10 = vadd.f32 %v3366_v59, %v914_v36  ;;  %v755_v46 = vmul.f32 0.015625, %v713_v18  ;;  %v717_v50 = vpop.xlane.xlu1 %716 }
 0x186   :  { %v3469_v3 = vadd.f32 %v3366_v59, %v916_v19  ;;  %v757_v44 = vmul.f32 0.015625, %v717_v50  ;;  %1214 = vrot.lane.b32.xlu1 %v3460_v9, %s2624_s0  ;;  %1084 = vrot.lane.b32.xlu0 %v1067_v31, %s2624_s0 }
 0x187   :  { %1030 = vst [vmem:[#allocation2 + $0xf1] sm:$0xff] %v3464_v10  ;;  %v787_v28 = vsel %vm249_vm1, %v755_v46, %v627_v37  ;;  %v3479_v40 = vpack.c.bf16 %v3464_v10, %v3434_v42 }
 0x188   :  { %v2497_v58 = vpop.eup %2496  ;;  %1032 = vst [vmem:[#allocation2 + $0x111] sm:$0xff] %v3469_v3  ;;  %v819_v8 = vadd.f32 1e-05, %v787_v28  ;;  %v789_v11 = vsel %vm249_vm1, %v757_v44, %v629_v45  ;;  %v561_v43 = vpop.xlane.xlu0 %560  ;;  %v1424_v39 = vpack.c.bf16 %v3469_v3, %v3464_v10 }
 0x189   :  { %v2499_v51 = vpop.eup %2498  ;;  %v879_v52 = vmul.f32 %v2497_v58, %v3054_v16  ;;  %v821_v5 = vadd.f32 1e-05, %v789_v11  ;;  %v599_v63 = vmul.f32 0.015625, %v561_v43  ;;  %v565_v12 = vpop.xlane.xlu1 %564 }
 0x18a   :  { %v881_v15 = vmul.f32 %v2499_v51, %v3057_v41  ;;  %2500 = vrsqrt.f32 %v819_v8  ;;  %v601_v20 = vmul.f32 0.015625, %v565_v12  ;;  %1439 = vrot.lane.b32.xlu0 %v1422_v54, %s2624_s0 }
 0x18b   :  { %v918_v21 = vmul.f32 %v3358_v57, %v879_v52  ;;  %2502 = vrsqrt.f32 %v821_v5  ;;  %v631_v27 = vsel %vm85_vm0, %v599_v63, 0.0 }
 0x18c   :  { %v920_v53 = vmul.f32 %v3358_v57, %v881_v15  ;;  %v721_v36 = vpop.xlane.xlu0 %720  ;;  %v633_v19 = vsel %vm85_vm0, %v601_v20, 0.0 }
 0x18d   :  { %v3496_v16 = vadd.f32 %v3366_v59, %v918_v21  ;;  %v759_v41 = vmul.f32 0.015625, %v721_v36  ;;  %v725_v37 = vpop.xlane.xlu1 %724 }
 0x18e   :  { %v3501_v18 = vadd.f32 %v3366_v59, %v920_v53  ;;  %v761_v31 = vmul.f32 0.015625, %v725_v37 }
 0x18f   :  { %1034 = vst [vmem:[#allocation2 + $0x151] sm:$0xff] %v3496_v16  ;;  %v791_v45 = vsel %vm249_vm1, %v759_v41, %v631_v27  ;;  %v213_v27 = vmul.f32 0.015625, %v3337_v30  ;;  %v215_v41 = vmul.f32 0.015625, %v3339_v32 }
 0x190   :  { %1036 = vst [vmem:[#allocation2 + $0x171] sm:$0xff] %v3501_v18  ;;  %v823_v46 = vadd.f32 1e-05, %v791_v45  ;;  %v793_v50 = vsel %vm249_vm1, %v761_v31, %v633_v19  ;;  %v569_v44 = vpop.xlane.xlu0 %568  ;;  %v1425_v28 = vpack.c.bf16 %v3501_v18, %v3496_v16 }
 0x191   :  { %v825_v58 = vadd.f32 1e-05, %v793_v50  ;;  %v603_v8 = vmul.f32 0.015625, %v569_v44  ;;  %v573_v11 = vpop.xlane.xlu1 %572 }
 0x192   :  { %2504 = vrsqrt.f32 %v823_v46  ;;  %v605_v43 = vmul.f32 0.015625, %v573_v11  ;;  %v380_v46 = vmul.f32 0.015625, %v3431_v25 }
 0x193   :  { %2506 = vrsqrt.f32 %v825_v58  ;;  %v635_v51 = vsel %vm85_vm0, %v603_v8, 0.0  ;;  %v378_v58 = vmul.f32 0.015625, %v3426_v47 }
 0x194   :  { %v2501_v54 = vpop.eup %2500  ;;  %v729_v52 = vpop.xlane.xlu0 %728  ;;  %v637_v12 = vsel %vm85_vm0, %v605_v43, 0.0  ;;  %v245_v43 = vsel %vm85_vm0, %v213_v27, 0.0 }
 0x195   :  { %v2503_v5 = vpop.eup %2502  ;;  %v883_v63 = vmul.f32 %v2501_v54, %v3080_v17  ;;  %v763_v15 = vmul.f32 0.015625, %v729_v52  ;;  %v733_v20 = vpop.xlane.xlu1 %732  ;;  %v247_v54 = vsel %vm85_vm0, %v215_v41, 0.0 }
 0x196   :  { %v885_v21 = vmul.f32 %v2503_v5, %v3083_v14  ;;  %v765_v53 = vmul.f32 0.015625, %v733_v20 }
 0x197   :  { %v922_v36 = vmul.f32 %v3358_v57, %v883_v63  ;;  %v795_v19 = vsel %vm249_vm1, %v763_v15, %v635_v51  ;;  %v412_v63 = vsel %vm249_vm1, %v380_v46, %v247_v54 }
 0x198   :  { %v924_v37 = vmul.f32 %v3358_v57, %v885_v21  ;;  %v827_v17 = vadd.f32 1e-05, %v795_v19  ;;  %v797_v31 = vsel %vm249_vm1, %v765_v53, %v637_v12  ;;  %v511_v45 = vpop.xlane.xlu0 %510  ;;  %v410_v53 = vsel %vm249_vm1, %v378_v58, %v245_v43  ;;  %v2545_v58 = vld [vmem:[#allocation4 + $0xe0] sm:$0xff] }
 0x199   :  { %v3527_v14 = vadd.f32 %v3366_v59, %v922_v36  ;;  %v829_v30 = vadd.f32 1e-05, %v797_v31  ;;  %v574_v50 = vmul.f32 0.015625, %v511_v45  ;;  %v515_v44 = vpop.xlane.xlu1 %514  ;;  %v2544_v45 = vld [vmem:[#allocation4 + $0xf0] sm:$0xff] }
 0x19a   :  { %v3531_v8 = vadd.f32 %v3366_v59, %v924_v37  ;;  %2508 = vrsqrt.f32 %v827_v17  ;;  %v576_v32 = vmul.f32 0.015625, %v515_v44  ;;  %v3561_v46 = vsub.f32 %v2544_v45, %v412_v63 }
 0x19b   :  { %1038 = vst [vmem:[#allocation2 + $0x191] sm:$0xff] %v3527_v14  ;;  %2510 = vrsqrt.f32 %v829_v30  ;;  %v3536_v11 = vpack.c.bf16 %v3527_v14, %v3501_v18  ;;  %v606_v47 = vsel %vm85_vm0, %v574_v50, 0.0 }
 0x19c   :  { %v2505_v25 = vpop.eup %2504  ;;  %1040 = vst [vmem:[#allocation2 + $0x1b1] sm:$0xff] %v3531_v8  ;;  %v671_v51 = vpop.xlane.xlu0 %670  ;;  %v1426_v52 = vpack.c.bf16 %v3531_v8, %v3527_v14  ;;  %v608_v15 = vsel %vm85_vm0, %v576_v32, 0.0  ;;  %v3566_v32 = vsub.f32 %v2545_v58, %v410_v53  ;;  %v476_v63 = vmul.f32 %v3561_v46, %v3561_v46 }
 0x19d   :  { %v2507_v5 = vpop.eup %2506  ;;  %v887_v12 = vmul.f32 %v2505_v25, %v3108_v48  ;;  %v734_v20 = vmul.f32 0.015625, %v671_v51  ;;  %v675_v21 = vpop.xlane.xlu1 %674 }
 0x19e   :  { %v889_v27 = vmul.f32 %v2507_v5, %v3111_v49  ;;  %v736_v36 = vmul.f32 0.015625, %v675_v21 }
 0x19f   :  { %v926_v19 = vmul.f32 %v3358_v57, %v887_v12  ;;  %v766_v41 = vsel %vm249_vm1, %v734_v20, %v606_v47 }
 0x1a0   :  { %v928_v37 = vmul.f32 %v3358_v57, %v889_v27  ;;  %v798_v17 = vadd.f32 1e-05, %v766_v41  ;;  %v768_v48 = vsel %vm249_vm1, %v736_v36, %v608_v15  ;;  %v519_v31 = vpop.xlane.xlu0 %518  ;;  %v474_v36 = vmul.f32 %v3566_v32, %v3566_v32 }
 0x1a1   :  { %v3564_v30 = vadd.f32 %v3366_v59, %v926_v19  ;;  %v800_v49 = vadd.f32 1e-05, %v768_v48  ;;  %v578_v50 = vmul.f32 0.015625, %v519_v31  ;;  %v523_v44 = vpop.xlane.xlu1 %522 }
 0x1a2   :  { %v3569_v25 = vadd.f32 %v3366_v59, %v928_v37  ;;  %2512 = vrsqrt.f32 %v798_v17  ;;  %v580_v43 = vmul.f32 0.015625, %v523_v44 }
 0x1a3   :  { %1042 = vst [vmem:[#allocation2 + $0x1d1] sm:$0xff] %v3564_v30  ;;  %2514 = vrsqrt.f32 %v800_v49  ;;  %v3574_v54 = vpack.c.bf16 %v3564_v30, %v3531_v8  ;;  %v610_v51 = vsel %vm85_vm0, %v578_v50, 0.0  ;;  %v508_v49 = vsel %vm85_vm0, %v476_v63, 0.0 }
 0x1a4   :  { %v2509_v47 = vpop.eup %2508  ;;  %1044 = vst [vmem:[#allocation2 + $0x1f1] sm:$0xff] %v3569_v25  ;;  %v679_v5 = vpop.xlane.xlu0 %678  ;;  %v1427_v12 = vpack.c.bf16 %v3569_v25, %v3564_v30  ;;  %v612_v21 = vsel %vm85_vm0, %v580_v43, 0.0  ;;  %v506_v43 = vsel %vm85_vm0, %v474_v36, 0.0 }
 0x1a5   :  { %v2511_v15 = vpop.eup %2510  ;;  %v891_v20 = vmul.f32 %v2509_v47, %v3134_v22  ;;  %v738_v53 = vmul.f32 0.015625, %v679_v5  ;;  %v683_v27 = vpop.xlane.xlu1 %682 }
 0x1a6   :  { %v893_v19 = vmul.f32 %v2511_v15, %v3137_v23  ;;  %v740_v41 = vmul.f32 0.015625, %v683_v27 }
 0x1a7   :  { %v930_v37 = vmul.f32 %v3358_v57, %v891_v20  ;;  %v770_v17 = vsel %vm249_vm1, %v738_v53, %v610_v51 }
 0x1a8   :  { %v932_v48 = vmul.f32 %v3358_v57, %v893_v19  ;;  %v802_v31 = vadd.f32 1e-05, %v770_v17  ;;  %v772_v22 = vsel %vm249_vm1, %v740_v41, %v612_v21  ;;  %v527_v45 = vpop.xlane.xlu0 %526 }
 0x1a9   :  { %v3598_v50 = vadd.f32 %v3366_v59, %v930_v37  ;;  %v804_v23 = vadd.f32 1e-05, %v772_v22  ;;  %v582_v44 = vmul.f32 0.015625, %v527_v45  ;;  %v531_v58 = vpop.xlane.xlu1 %530  ;;  %570 = vadd.xlane.f32.xlu0 %v508_v49 }
 0x1aa   :  { %v3603_v47 = vadd.f32 %v3366_v59, %v932_v48  ;;  %2516 = vrsqrt.f32 %v802_v31  ;;  %v584_v51 = vmul.f32 0.015625, %v531_v58  ;;  %566 = vadd.xlane.f32.xlu1 %v506_v43  ;;  %v666_v48 = vsel %vm249_vm1, %v474_v36, 0.0 }
 0x1ab   :  { %1046 = vst [vmem:[#allocation2 + $0x211] sm:$0xff] %v3598_v50  ;;  %2518 = vrsqrt.f32 %v804_v23  ;;  %v3608_v5 = vpack.c.bf16 %v3598_v50, %v3569_v25  ;;  %v614_v20 = vsel %vm85_vm0, %v582_v44, 0.0 }
 0x1ac   :  { %v2513_v15 = vpop.eup %2512  ;;  %1048 = vst [vmem:[#allocation2 + $0x231] sm:$0xff] %v3603_v47  ;;  %v687_v21 = vpop.xlane.xlu0 %686  ;;  %v1428_v53 = vpack.c.bf16 %v3603_v47, %v3598_v50  ;;  %v616_v41 = vsel %vm85_vm0, %v584_v51, 0.0  ;;  %v1472_v50 = vld [vmem:[#allocation2 + $0x91] sm:$0xff] }
 0x1ad   :  { %v2515_v27 = vpop.eup %2514  ;;  %v862_v19 = vmul.f32 %v2513_v15, %v3160_v55  ;;  %v742_v37 = vmul.f32 0.015625, %v687_v21  ;;  %v691_v17 = vpop.xlane.xlu1 %690  ;;  %v1479_v47 = vld [vmem:[#allocation2 + $0x191] sm:$0xff] }
 0x1ae   :  { %v864_v31 = vmul.f32 %v2515_v27, %v3163_v56  ;;  %v744_v22 = vmul.f32 0.015625, %v691_v17  ;;  %726 = vadd.xlane.f32.xlu1 %v666_v48  ;;  %v668_v56 = vsel %vm249_vm1, %v476_v63, 0.0 }
 0x1af   :  { %v901_v45 = vmul.f32 %v3358_v57, %v862_v19  ;;  %v774_v49 = vsel %vm249_vm1, %v742_v37, %v614_v20 }
 0x1b0   :  { %v903_v23 = vmul.f32 %v3358_v57, %v864_v31  ;;  %v806_v55 = vadd.f32 1e-05, %v774_v49  ;;  %v776_v44 = vsel %vm249_vm1, %v744_v22, %v616_v41  ;;  %v535_v58 = vpop.xlane.xlu0 %534 }
 0x1b1   :  { %v940_v43 = vadd.f32 %v3366_v59, %v901_v45  ;;  %v808_v51 = vadd.f32 1e-05, %v776_v44  ;;  %v586_v36 = vmul.f32 0.015625, %v535_v58  ;;  %v539_v15 = vpop.xlane.xlu1 %538 }
 0x1b2   :  { %v942_v21 = vadd.f32 %v3366_v59, %v903_v23  ;;  %2520 = vrsqrt.f32 %v806_v55  ;;  %v588_v27 = vmul.f32 0.015625, %v539_v15  ;;  %730 = vadd.xlane.f32.xlu1 %v668_v56 }
 0x1b3   :  { %1017 = vst [vmem:[#allocation2 + $0x21] sm:$0xff] %v940_v43  ;;  %2522 = vrsqrt.f32 %v808_v51  ;;  %v618_v19 = vsel %vm85_vm0, %v586_v36, 0.0 }
 0x1b4   :  { %v2517_v20 = vpop.eup %2516  ;;  %1019 = vst [vmem:[#allocation2 + $0x41] sm:$0xff] %v942_v21  ;;  %v695_v41 = vpop.xlane.xlu0 %694  ;;  %v1292_v37 = vpack.c.bf16 %v942_v21, %v940_v43  ;;  %v620_v63 = vsel %vm85_vm0, %v588_v27, 0.0 }
 0x1b5   :  { %v2519_v17 = vpop.eup %2518  ;;  %v866_v48 = vmul.f32 %v2517_v20, %v3186_v33  ;;  %v746_v31 = vmul.f32 0.015625, %v695_v41  ;;  %v699_v22 = vpop.xlane.xlu1 %698 }
 0x1b6   :  { %v868_v45 = vmul.f32 %v2519_v17, %v3189_v34  ;;  %v748_v49 = vmul.f32 0.015625, %v699_v22  ;;  %1300 = vst.msk [vmem:[#allocation3 + $0x10] sm:$0xff] %vm1106_vm2, %v1292_v37 }
 0x1b7   :  { %v905_v23 = vmul.f32 %v3358_v57, %v866_v48  ;;  %v778_v55 = vsel %vm249_vm1, %v746_v31, %v618_v19  ;;  %1332 = vst.msk [vmem:[#allocation3 + $0x10] sm:$0xff] %vm1171_vm3, %v1292_v37 }
 0x1b8   :  { %v907_v44 = vmul.f32 %v3358_v57, %v868_v45  ;;  %v810_v33 = vadd.f32 1e-05, %v778_v55  ;;  %v780_v58 = vsel %vm249_vm1, %v748_v49, %v620_v63  ;;  %v543_v43 = vpop.xlane.xlu0 %542  ;;  %v1345_v49 = vld [vmem:[#allocation2 + $0xb0] sm:$0xff] }
 0x1b9   :  { %v944_v51 = vadd.f32 %v3366_v59, %v905_v23  ;;  %v812_v34 = vadd.f32 1e-05, %v780_v58  ;;  %v590_v36 = vmul.f32 0.015625, %v543_v43  ;;  %v547_v15 = vpop.xlane.xlu1 %546  ;;  %v3653_v23 = vld [vmem:[#allocation2 + $0xd0] sm:$0xff] }
 0x1ba   :  { %v946_v56 = vadd.f32 %v3366_v59, %v907_v44  ;;  %2524 = vrsqrt.f32 %v810_v33  ;;  %v592_v21 = vmul.f32 0.015625, %v547_v15  ;;  %v1359_v15 = vpack.c.bf16 %v3653_v23, %v1345_v49 }
 0x1bb   :  { %1021 = vst [vmem:[#allocation2 + $0x61] sm:$0xff] %v944_v51  ;;  %2526 = vrsqrt.f32 %v812_v34  ;;  %v622_v20 = vsel %vm85_vm0, %v590_v36, 0.0 }
 0x1bc   :  { %v2521_v27 = vpop.eup %2520  ;;  %1023 = vst [vmem:[#allocation2 + $0x81] sm:$0xff] %v946_v56  ;;  %v703_v19 = vpop.xlane.xlu0 %702  ;;  %v1293_v41 = vpack.c.bf16 %v946_v56, %v944_v51  ;;  %v624_v48 = vsel %vm85_vm0, %v592_v21, 0.0 }
 0x1bd   :  { %v2523_v37 = vpop.eup %2522  ;;  %v870_v17 = vmul.f32 %v2521_v27, %v3212_v60  ;;  %v750_v63 = vmul.f32 0.015625, %v703_v19  ;;  %v707_v31 = vpop.xlane.xlu1 %706 }
 0x1be   :  { %v872_v22 = vmul.f32 %v2523_v37, %v3215_v61  ;;  %v752_v45 = vmul.f32 0.015625, %v707_v31  ;;  %1301 = vst.msk [vmem:[#allocation3 + $0x38] sm:$0xff] %vm1106_vm2, %v1293_v41 }
 0x1bf   :  { %v909_v55 = vmul.f32 %v3358_v57, %v870_v17  ;;  %v782_v44 = vsel %vm249_vm1, %v750_v63, %v622_v20  ;;  %1149 = vrot.lane.b32.xlu0 %v3460_v9, %s2624_s0  ;;  %1333 = vst.msk [vmem:[#allocation3 + $0x38] sm:$0xff] %vm1171_vm3, %v1293_v41  ;;  %v1068_v63 = vpack.c.bf16 %v1345_v49, %v3438_v24 }
 0x1c0   :  { %v911_v60 = vmul.f32 %v3358_v57, %v872_v22  ;;  %v814_v33 = vadd.f32 1e-05, %v782_v44  ;;  %v784_v61 = vsel %vm249_vm1, %v752_v45, %v624_v48  ;;  %v551_v58 = vpop.xlane.xlu0 %550 }
 0x1c1   :  { %v948_v43 = vadd.f32 %v3366_v59, %v909_v55  ;;  %v816_v51 = vadd.f32 1e-05, %v784_v61  ;;  %v594_v34 = vmul.f32 0.015625, %v551_v58  ;;  %v555_v36 = vpop.xlane.xlu1 %554  ;;  %v1347_v58 = vld [vmem:[#allocation2 + $0xf0] sm:$0xff] }
 0x1c2   :  { %v950_v56 = vadd.f32 %v3366_v59, %v911_v60  ;;  %2528 = vrsqrt.f32 %v814_v33  ;;  %v596_v9 = vmul.f32 0.015625, %v555_v36  ;;  %v1069_v36 = vpack.c.bf16 %v1347_v58, %v3653_v23 }
 0x1c3   :  { %1025 = vst [vmem:[#allocation2 + $0xa1] sm:$0xff] %v948_v43  ;;  %2530 = vrsqrt.f32 %v816_v51  ;;  %1377 = vrot.lane.b32.xlu0 %v1359_v15, %s2624_s0  ;;  %1216 = vrot.lane.b32.xlu1 %v3442_v29, %s2624_s0  ;;  %v626_v27 = vsel %vm85_vm0, %v594_v34, 0.0  ;;  %v1348_v51 = vld [vmem:[#allocation2 + $0x110] sm:$0xff] }
 0x1c4   :  { %v2525_v21 = vpop.eup %2524  ;;  %1027 = vst [vmem:[#allocation2 + $0xc1] sm:$0xff] %v950_v56  ;;  %v711_v20 = vpop.xlane.xlu0 %710  ;;  %v628_v37 = vsel %vm85_vm0, %v596_v9, 0.0 }
 0x1c5   :  { %v2527_v19 = vpop.eup %2526  ;;  %v874_v41 = vmul.f32 %v2525_v21, %v3238_v35  ;;  %v754_v17 = vmul.f32 0.015625, %v711_v20  ;;  %v715_v48 = vpop.xlane.xlu1 %714 }
 0x1c6   :  { %v876_v31 = vmul.f32 %v2527_v19, %v3241_v38  ;;  %v756_v22 = vmul.f32 0.015625, %v715_v48 }
 0x1c7   :  { %v913_v45 = vmul.f32 %v3358_v57, %v874_v41  ;;  %v786_v55 = vsel %vm249_vm1, %v754_v17, %v626_v27  ;;  %1086 = vrot.lane.b32.xlu0 %v1068_v63, %s2624_s0  ;;  %1441 = vrot.lane.b32.xlu1 %v1423_v62, %s2624_s0  ;;  %v1360_v41 = vpack.c.bf16 %v1348_v51, %v1347_v58 }
 0x1c8   :  { %v915_v35 = vmul.f32 %v3358_v57, %v876_v31  ;;  %v818_v44 = vadd.f32 1e-05, %v786_v55  ;;  %v788_v24 = vsel %vm249_vm1, %v756_v22, %v628_v37  ;;  %v559_v38 = vpop.xlane.xlu0 %558  ;;  %v1188_v31 = vld [vmem:[#allocation2 + $0x131] sm:$0xff] }
 0x1c9   :  { %v952_v49 = vadd.f32 %v3366_v59, %v913_v45  ;;  %v820_v60 = vadd.f32 1e-05, %v788_v24  ;;  %v563_v33 = vpop.xlane.xlu1 %562  ;;  %v598_v61 = vmul.f32 0.015625, %v559_v38  ;;  %v1349_v55 = vld [vmem:[#allocation2 + $0x150] sm:$0xff] }
 0x1ca   :  { %v954_v43 = vadd.f32 %v3366_v59, %v915_v35  ;;  %2532 = vrsqrt.f32 %v818_v44  ;;  %v1280_v34 = vld [vmem:[#allocation2 + $0xa1] sm:$0xff]  ;;  %v600_v27 = vmul.f32 0.015625, %v563_v33  ;;  %v3712_v35 = vld [vmem:[#allocation2 + $0x170] sm:$0xff] }
 0x1cb   :  { %1029 = vst [vmem:[#allocation2 + $0xe1] sm:$0xff] %v952_v49  ;;  %2534 = vrsqrt.f32 %v820_v60  ;;  %1151 = vrot.lane.b32.xlu0 %v3442_v29, %s2624_s0  ;;  %1218 = vrot.lane.b32.xlu1 %v3479_v40, %s2624_s0  ;;  %v1294_v26 = vpack.c.bf16 %v950_v56, %v1280_v34  ;;  %v1313_v42 = vld [vmem:[#allocation2 + $0xc1] sm:$0xff]  ;;  %v630_v20 = vsel %vm85_vm0, %v598_v61, 0.0  ;;  %v1361_v10 = vpack.c.bf16 %v3712_v35, %v1349_v55 }
 0x1cc   :  { %v2529_v62 = vpop.eup %2528  ;;  %1031 = vst [vmem:[#allocation2 + $0x101] sm:$0xff] %v954_v43  ;;  %v1326_v15 = vpack.c.bf16 %v1313_v42, %v1280_v34  ;;  %v632_v48 = vsel %vm85_vm0, %v600_v27, 0.0  ;;  %v1200_v34 = vpack.c.bf16 %v3496_v16, %v1188_v31  ;;  %v1353_v31 = vld [vmem:[#allocation2 + $0x1d0] sm:$0xff] }
 0x1cd   :  { %v2531_v9 = vpop.eup %2530  ;;  %v878_v21 = vmul.f32 %v2529_v62, %v3264_v1  ;;  %v719_v19 = vpop.xlane.xlu1 %718  ;;  %1302 = vst.msk [vmem:[#allocation3 + $0x60] sm:$0xff] %vm1106_vm2, %v1294_v26 }
 0x1ce   :  { %v880_v29 = vmul.f32 %v2531_v9, %v3267_v6  ;;  %v758_v56 = vmul.f32 0.015625, %v719_v19  ;;  %1334 = vst.msk [vmem:[#allocation3 + $0x60] sm:$0xff] %vm1171_vm3, %v1326_v15  ;;  %v1244_v9 = vld [vmem:[#allocation2 + $0x20] sm:$0xff]  ;;  %v1352_v19 = vld [vmem:[#allocation2 + $0x1b0] sm:$0xff] }
 0x1cf   :  { %v917_v37 = vmul.f32 %v3358_v57, %v878_v21  ;;  %1379 = vrot.lane.b32.xlu0 %v1360_v41, %s2624_s0  ;;  %1088 = vrot.lane.b32.xlu1 %v1069_v36, %s2624_s0  ;;  %v1245_v21 = vld [vmem:[#allocation2 + $0x40] sm:$0xff]  ;;  %v1072_v14 = vpack.c.bf16 %v1353_v31, %v1352_v19 }
 0x1d0   :  { %v919_v1 = vmul.f32 %v3358_v57, %v880_v29  ;;  %v790_v23 = vsel %vm249_vm1, %v758_v56, %v630_v20  ;;  %v1351_v20 = vld [vmem:[#allocation2 + $0x190] sm:$0xff]  ;;  %v1260_v18 = vpack.c.bf16 %v1245_v21, %v1244_v9  ;;  %v3760_v56 = vld [vmem:[%s3953_s3] ss:$0 sm:$0xff] }
 0x1d1   :  { %v956_v17 = vadd.f32 %v3366_v59, %v917_v37  ;;  %v822_v6 = vadd.f32 1e-05, %v790_v23  ;;  %v723_v63 = vpop.xlane.xlu1 %722  ;;  %v1362_v41 = vpack.c.bf16 %v1352_v19, %v1351_v20  ;;  %v1071_v29 = vpack.c.bf16 %v1351_v20, %v3712_v35  ;;  %v1474_v20 = vld [vmem:[#allocation2 + $0xd1] sm:$0xff] }
 0x1d2   :  { %v958_v22 = vadd.f32 %v3366_v59, %v919_v1  ;;  %v760_v45 = vmul.f32 0.015625, %v723_v63  ;;  %v1282_v44 = vld [vmem:[#allocation2 + $0xe1] sm:$0xff]  ;;  %v1481_v19 = vld [vmem:[#allocation2 + $0x1d1] sm:$0xff] }
 0x1d3   :  { %1033 = vst [vmem:[#allocation2 + $0x141] sm:$0xff] %v956_v17  ;;  %2536 = vrsqrt.f32 %v822_v6  ;;  %1443 = vrot.lane.b32.xlu0 %v1424_v39, %s2624_s0  ;;  %1153 = vrot.lane.b32.xlu1 %v3479_v40, %s2624_s0  ;;  %v1295_v24 = vpack.c.bf16 %v954_v43, %v1282_v44  ;;  %v1315_v38 = vld [vmem:[#allocation2 + $0x101] sm:$0xff]  ;;  %v1058_v40 = vld [vmem:[#allocation2 + $0x130] sm:$0xff] }
 0x1d4   :  { %v2533_v49 = vpop.eup %2532  ;;  %1035 = vst [vmem:[#allocation2 + $0x161] sm:$0xff] %v958_v22  ;;  %v792_v60 = vsel %vm249_vm1, %v760_v45, %v632_v48  ;;  %v1327_v33 = vpack.c.bf16 %v1315_v38, %v1282_v44  ;;  %v3727_v39 = vld [vmem:[#allocation7 + $0x100] sm:$0xff]   ;;  %v1070_v26 = vpack.c.bf16 %v1349_v55, %v1058_v40  ;;  %v1354_v22 = vld [vmem:[#allocation2 + $0x1f0] sm:$0xff] }
 0x1d5   :  { %v2535_v61 = vpop.eup %2534  ;;  %v882_v58 = vmul.f32 %v2533_v49, %v3290_v13  ;;  %v824_v51 = vadd.f32 1e-05, %v792_v60  ;;  %1303 = vst.msk [vmem:[#allocation3 + $0x88] sm:$0xff] %vm1106_vm2, %v1295_v24  ;;  %2404 = vmatprep.subr.bf16.mxu0 %v3727_v39  ;;  %2428 = vmatprep.subr.bf16.mxu1 %v3727_v39  ;;  %v1355_v38 = vld [vmem:[#allocation2 + $0x210] sm:$0xff]  ;;  %v1251_v2 = vld [vmem:[#allocation2 + $0x100] sm:$0xff] }
 0x1d6   :  { %v884_v3 = vmul.f32 %v2535_v61, %v3293_v4  ;;  %1335 = vst.msk [vmem:[#allocation3 + $0x88] sm:$0xff] %vm1171_vm3, %v1327_v33  ;;  %v1356_v49 = vld [vmem:[#allocation2 + $0x230] sm:$0xff]  ;;  %v1073_v60 = vpack.c.bf16 %v1355_v38, %v1354_v22  ;;  %v1247_v33 = vld [vmem:[#allocation2 + $0x80] sm:$0xff] }
 0x1d7   :  { %v921_v43 = vmul.f32 %v3358_v57, %v882_v58  ;;  %2538 = vrsqrt.f32 %v824_v51  ;;  %1220 = vrot.lane.b32.xlu0 %v1200_v34, %s2624_s0  ;;  %1381 = vrot.lane.b32.xlu1 %v1361_v10, %s2624_s0  ;;  %v1246_v61 = vld [vmem:[#allocation2 + $0x60] sm:$0xff]  ;;  %v2477_v10 = vld [vmem:[#allocation7 + $0x108] sm:$0xff]   ;;  %v1477_v40 = vld [vmem:[#allocation2 + $0x151] sm:$0xff] }
 0x1d8   :  { %v923_v13 = vmul.f32 %v3358_v57, %v884_v3  ;;  %v1261_v51 = vpack.c.bf16 %v1247_v33, %v1246_v61  ;;  %v1470_v3 = vld [vmem:[#allocation2 + $0x51] sm:$0xff] }
 0x1d9   :  { %v960_v4 = vadd.f32 %v3366_v59, %v921_v43  ;;  %v1478_v43 = vld [vmem:[#allocation2 + $0x171] sm:$0xff] }
 0x1da   :  { %v962_v42 = vadd.f32 %v3366_v59, %v923_v13  ;;  %v1284_v62 = vld [vmem:[#allocation2 + $0x141] sm:$0xff]  ;;  %v3752_v59 = vld [vmem:[%s3952_s2] ss:$0 sm:$0xff] }
 0x1db   :  { %1037 = vst [vmem:[#allocation2 + $0x181] sm:$0xff] %v960_v4  ;;  %1090 = vrot.lane.b32.xlu0 %v1070_v26, %s2624_s0  ;;  %1445 = vrot.lane.b32.xlu1 %v1425_v28, %s2624_s0  ;;  %v1285_v36 = vld [vmem:[#allocation2 + $0x161] sm:$0xff]  ;;  %v1469_v26 = vld [vmem:[#allocation2 + $0x31] sm:$0xff] }
 0x1dc   :  { %1039 = vst [vmem:[#allocation2 + $0x1a1] sm:$0xff] %v962_v42  ;;  %v1296_v57 = vpack.c.bf16 %v1285_v36, %v1284_v62  ;;  %v1535_v42 = vld [vmem:[#allocation3 + $0x10] sm:$0xff]  ;;  %v1485_v62 = vpack.c.bf16 %v1470_v3, %v1469_v26  ;;  %v1489_v36 = vpack.c.bf16 %v1478_v43, %v1477_v40 }
 0x1dd   :  { %v2537_v15 = vpop.eup %2536 }
 0x1de   :  { %v886_v27 = vmul.f32 %v2537_v15, %v3319_v7  ;;  %1304 = vst.msk [vmem:[#allocation3 + $0xb0] sm:$0xff] %vm1106_vm2, %v1296_v57  ;;  %v2478_v15 = vld [vmem:[#allocation7 + $0x110] sm:$0xff]  }
 0x1df   :  { %1155 = vrot.lane.b32.xlu0 %v1200_v34, %s2624_s0  ;;  %1222 = vrot.lane.b32.xlu1 %v3536_v11, %s2624_s0  ;;  %1336 = vst.msk [vmem:[#allocation3 + $0xb0] sm:$0xff] %vm1171_vm3, %v1296_v57  ;;  %v1471_v57 = vld [vmem:[#allocation2 + $0x71] sm:$0xff] }
 0x1e0   :  { %v925_v16 = vmul.f32 %v3752_v59, %v886_v27  ;;  %v1213_v7 = vpop.permute.xlu0 %1212  ;;  %v1486_v9 = vpack.c.bf16 %v1472_v50, %v1471_v57  ;;  %v1473_v27 = vld [vmem:[#allocation2 + $0xb1] sm:$0xff]  ;;  %v1253_v50 = vld [vmem:[#allocation2 + $0x160] sm:$0xff] }
 0x1e1   :  { %v2539_v28 = vpop.eup %2538  ;;  %1236 = vst.msk [vmem:[#allocation3 + $0x8] sm:$0xff] %vm1106_vm2, %v1213_v7 }
 0x1e2   :  { %v964_v37 = vadd.f32 %v3760_v56, %v925_v16  ;;  %v888_v1 = vmul.f32 %v2539_v28, %v3316_v0  ;;  %1268 = vst.msk [vmem:[#allocation3 + $0x8] sm:$0xff] %vm1171_vm3, %v1260_v18  ;;  %v1286_v23 = vld [vmem:[#allocation2 + $0x181] sm:$0xff]  ;;  %v1363_v0 = vpack.c.bf16 %v1354_v22, %v1353_v31  ;;  %v1482_v16 = vld [vmem:[#allocation2 + $0x1f1] sm:$0xff]  ;;  %v1487_v28 = vpack.c.bf16 %v1474_v20, %v1473_v27 }
 0x1e3   :  { %1383 = vrot.lane.b32.xlu0 %v1362_v41, %s2624_s0  ;;  %1092 = vrot.lane.b32.xlu1 %v1071_v29, %s2624_s0  ;;  %v1287_v17 = vld [vmem:[#allocation2 + $0x1a1] sm:$0xff]  ;;  %v2479_v18 = vld [vmem:[#allocation7 + $0x118] sm:$0xff]   ;;  %v1491_v41 = vpack.c.bf16 %v1482_v16, %v1481_v19 }
 0x1e4   :  { %1041 = vst [vmem:[#allocation2 + $0x1c1] sm:$0xff] %v964_v37  ;;  %v927_v48 = vmul.f32 %v3752_v59, %v888_v1  ;;  %v1297_v6 = vpack.c.bf16 %v1287_v17, %v1286_v23  ;;  %v1475_v29 = vld [vmem:[#allocation2 + $0xf1] sm:$0xff] }
 0x1e5   :  { %v1476_v37 = vld [vmem:[#allocation2 + $0x111] sm:$0xff] }
 0x1e6   :  { %v966_v63 = vadd.f32 %v3760_v56, %v927_v48  ;;  %1305 = vst.msk [vmem:[#allocation3 + $0xd8] sm:$0xff] %vm1106_vm2, %v1297_v6  ;;  %v1483_v1 = vld [vmem:[#allocation2 + $0x211] sm:$0xff]  ;;  %v1488_v17 = vpack.c.bf16 %v1476_v37, %v1475_v29  ;;  %v1255_v29 = vld [vmem:[#allocation2 + $0x1a0] sm:$0xff] }
 0x1e7   :  { %1447 = vrot.lane.b32.xlu0 %v1426_v52, %s2624_s0  ;;  %1157 = vrot.lane.b32.xlu1 %v3536_v11, %s2624_s0  ;;  %1337 = vst.msk [vmem:[#allocation3 + $0xd8] sm:$0xff] %vm1171_vm3, %v1297_v6  ;;  %v1148_v11 = vpop.permute.xlu0 %1147  ;;  %v1484_v23 = vld [vmem:[#allocation2 + $0x231] sm:$0xff]  ;;  %v1254_v37 = vld [vmem:[#allocation2 + $0x180] sm:$0xff] }
 0x1e8   :  { %1043 = vst [vmem:[#allocation2 + $0x1e1] sm:$0xff] %v966_v63  ;;  %v1492_v48 = vpack.c.bf16 %v1484_v23, %v1483_v1 }
 0x1e9   :  { %v1534_v45 = vld [vmem:[#allocation3 + $0x8] sm:$0xff] }
 0x1ea   :  { %1924 = vmatprep.mubr.bf16.mxu0 %v1534_v45 }
 0x1eb   :  { %1385 = vrot.lane.b32.xlu1 %v1363_v0, %s2624_s0  ;;  %1224 = vrot.lane.b32.xlu0 %v3574_v54, %s2624_s0  ;;  %v1288_v55 = vld [vmem:[#allocation2 + $0x1c1] sm:$0xff] }
 0x1ec   :  { %v1374_v35 = vpop.permute.xlu1 %1373  ;;  %v1298_v44 = vpack.c.bf16 %v966_v63, %v1288_v55 }
 0x1ed   :  { %1397 = vst.msk [vmem:[#allocation3 + $0x18] sm:$0xff] %vm1106_vm2, %v1374_v35 }
 0x1ee   :  { %1306 = vst.msk [vmem:[#allocation3 + $0x100] sm:$0xff] %vm1106_vm2, %v1298_v44 }
 0x1ef   :  { %1449 = vrot.lane.b32.xlu1 %v1427_v12, %s2624_s0  ;;  %1094 = vrot.lane.b32.xlu0 %v1072_v14, %s2624_s0  ;;  %v1321_v8 = vld [vmem:[#allocation2 + $0x1e1] sm:$0xff]  ;;  %v1364_v12 = vpack.c.bf16 %v1356_v49, %v1355_v38 }
 0x1f0   :  { %v1083_v52 = vpop.permute.xlu1 %1082  ;;  %v1330_v24 = vpack.c.bf16 %v1321_v8, %v1288_v55  ;;  %v1248_v38 = vld [vmem:[#allocation2 + $0xa0] sm:$0xff] }
 0x1f1   :  { %1107 = vst.msk [vmem:[#allocation3] sm:$0xff] %vm1106_vm2, %v1083_v52 }
 0x1f2   :  { %1172 = vst.msk [vmem:[#allocation3] sm:$0xff] %vm1171_vm3, %v1148_v11  ;;  %1338 = vst.msk [vmem:[#allocation3 + $0x100] sm:$0xff] %vm1171_vm3, %v1330_v24  ;;  %v1249_v24 = vld [vmem:[#allocation2 + $0xc0] sm:$0xff] }
 0x1f3   :  { %1159 = vrot.lane.b32.xlu0 %v3574_v54, %s2624_s0  ;;  %1226 = vrot.lane.b32.xlu1 %v3608_v5, %s2624_s0  ;;  %v1262_v61 = vpack.c.bf16 %v1249_v24, %v1248_v38  ;;  %v1560_v24 = vld [vmem:[#allocation3 + $0xd8] sm:$0xff] }
 0x1f4   :  { %v1438_v30 = vpop.permute.xlu1 %1437  ;;  %v1376_v25 = vpop.permute.xlu0 %1375 }
 0x1f5   :  { %1461 = vst.msk [vmem:[#allocation3 + $0x18] sm:$0xff] %vm1171_vm3, %v1438_v30 }
 0x1f6   :  { %1398 = vst.msk [vmem:[#allocation3 + $0x40] sm:$0xff] %vm1106_vm2, %v1376_v25 }
 0x1f7   :  { %1387 = vrot.lane.b32.xlu0 %v1364_v12, %s2624_s0  ;;  %1096 = vrot.lane.b32.xlu1 %v1073_v60, %s2624_s0 }
 0x1f8   :  { %v1215_v58 = vpop.permute.xlu1 %1214  ;;  %v1085_v54 = vpop.permute.xlu0 %1084 }
 0x1f9   :  { %1237 = vst.msk [vmem:[#allocation3 + $0x30] sm:$0xff] %vm1106_vm2, %v1215_v58  ;;  %1108 = vst.msk [vmem:[#allocation3 + $0x28] sm:$0xff] %vm1106_vm2, %v1085_v54  ;;  %v1533_v34 = vld [vmem:[#allocation3] sm:$0xff] }
 0x1fa   :  { %1269 = vst.msk [vmem:[#allocation3 + $0x30] sm:$0xff] %vm1171_vm3, %v1261_v51  ;;  %1925 = vmatmul.mubr.bf16.vlgmr.msra.gmra.mrb[0].mxu0 %v1533_v34  ;;  %v1250_v54 = vld [vmem:[#allocation2 + $0xe0] sm:$0xff] }
 0x1fb   :  { %1451 = vrot.lane.b32.xlu0 %v1428_v53, %s2624_s0  ;;  %1161 = vrot.lane.b32.xlu1 %v3608_v5, %s2624_s0  ;;  %v1480_v53 = vld [vmem:[#allocation2 + $0x1b1] sm:$0xff]  ;;  %v1263_v40 = vpack.c.bf16 %v1251_v2, %v1250_v54 }
 0x1fc   :  { %v1440_v13 = vpop.permute.xlu0 %1439  ;;  %v1536_v4 = vld [vmem:[#allocation3 + $0x18] sm:$0xff]  ;;  %2405 = vmatpush3.bf16.msra.mxu0 %v3727_v39  ;;  %v1490_v21 = vpack.c.bf16 %v1480_v53, %v1479_v47  ;;  %v1545_v53 = vld [vmem:[#allocation3 + $0x60] sm:$0xff] }
 0x1fd   :  { %1462 = vst.msk [vmem:[#allocation3 + $0x40] sm:$0xff] %vm1171_vm3, %v1440_v13  ;;  %2021 = vmatprep.mubr.bf16.mxu1 %v1536_v4  ;;  %2406 = vmatprep.subr.bf16.mxu0 %v2477_v10 }
 0x1fe   :  { %2022 = vmatmul.mubr.bf16.vlgmr.msra.gmra.mrb[0].mxu1 %v1535_v42 }
 0x1ff   :  { %1501 = vrot.lane.b32.xlu0 %v1485_v62, %s2624_s0  ;;  %1509 = vrot.lane.b32.xlu1 %v1489_v36, %s2624_s0 }
 0x200   :  { %2432 = vmatpush3.bf16.msra.mxu1 %v3727_v39  ;;  %2407 = vmatpush3.bf16.msra.mxu0 %v2477_v10  ;;  %v1540_v39 = vld [vmem:[#allocation3 + $0x38] sm:$0xff] }
 0x201   :  { %v1539_v5 = vld [vmem:[#allocation3 + $0x30] sm:$0xff]  ;;  %2429 = vmatprep.subr.bf16.mxu1 %v2477_v10  ;;  %2408 = vmatprep.subr.bf16.mxu0 %v2478_v15 }
 0x202   :  { %1932 = vmatprep.mubr.bf16.mxu0 %v1539_v5 }
 0x203   :  { %1503 = vrot.lane.b32.xlu0 %v1486_v9, %s2624_s0  ;;  %1511 = vrot.lane.b32.xlu1 %v1490_v21, %s2624_s0 }
 0x204   :  { %v1541_v7 = vld [vmem:[#allocation3 + $0x40] sm:$0xff]  ;;  %2433 = vmatpush3.bf16.msra.mxu1 %v2477_v10  ;;  %2409 = vmatpush3.bf16.msra.mxu0 %v2478_v15 }
 0x205   :  { %2029 = vmatprep.mubr.bf16.mxu1 %v1541_v7  ;;  %2430 = vmatprep.subr.bf16.mxu1 %v2478_v15  ;;  %v1550_v7 = vld [vmem:[#allocation3 + $0x88] sm:$0xff] }
 0x206   :  { %2030 = vmatmul.mubr.bf16.gmra.mrb[4].mxu1 %v1540_v39  ;;  %2410 = vmatprep.subr.bf16.mxu0 %v2479_v18 }
 0x207   :  { %1505 = vrot.lane.b32.xlu0 %v1487_v28, %s2624_s0  ;;  %1513 = vrot.lane.b32.xlu1 %v1491_v41, %s2624_s0 }
 0x208   :  { %2434 = vmatpush3.bf16.msra.mxu1 %v2478_v15  ;;  %2411 = vmatpush3.bf16.msra.mxu0 %v2479_v18  ;;  %v1252_v15 = vld [vmem:[#allocation2 + $0x140] sm:$0xff] }
 0x209   :  { %2431 = vmatprep.subr.bf16.mxu1 %v2479_v18  ;;  %v1264_v9 = vpack.c.bf16 %v1253_v50, %v1252_v15 }
 0x20b   :  { %1507 = vrot.lane.b32.xlu0 %v1488_v17, %s2624_s0  ;;  %1515 = vrot.lane.b32.xlu1 %v1492_v48, %s2624_s0  ;;  %v1265_v17 = vpack.c.bf16 %v1255_v29, %v1254_v37 }
 0x20c   :  { %2435 = vmatpush3.bf16.msra.mxu1 %v2479_v18 }
 0x236   :  { %v571_v6 = vpop.xlane.xlu0 %570 }
 0x237   :  { %v567_v63 = vpop.xlane.xlu1 %566  ;;  %v604_v55 = vmul.f32 0.015625, %v571_v6 }
 0x238   :  { %v602_v31 = vmul.f32 0.015625, %v567_v63 }
 0x239   :  { %v636_v49 = vsel %vm85_vm0, %v604_v55, 0.0 }
 0x23a   :  { %v1150_v22 = vpop.permute.xlu0 %1149  ;;  %v634_v35 = vsel %vm85_vm0, %v602_v31, 0.0 }
 0x23b   :  { %1173 = vst.msk [vmem:[#allocation3 + $0x28] sm:$0xff] %vm1171_vm3, %v1150_v22  ;;  %v727_v0 = vpop.xlane.xlu1 %726  ;;  %v1257_v22 = vld [vmem:[#allocation2 + $0x1e0] sm:$0xff] }
 0x23c   :  { %v762_v45 = vmul.f32 0.015625, %v727_v0  ;;  %v1555_v0 = vld [vmem:[#allocation3 + $0xb0] sm:$0xff] }
 0x23e   :  { %v794_v44 = vsel %vm249_vm1, %v762_v45, %v634_v35  ;;  %v1378_v14 = vpop.permute.xlu0 %1377  ;;  %v1256_v45 = vld [vmem:[#allocation2 + $0x1c0] sm:$0xff] }
 0x23f   :  { %v826_v8 = vadd.f32 1e-05, %v794_v44  ;;  %1399 = vst.msk [vmem:[#allocation3 + $0x68] sm:$0xff] %vm1106_vm2, %v1378_v14  ;;  %v731_v11 = vpop.xlane.xlu1 %730  ;;  %v1266_v55 = vpack.c.bf16 %v1257_v22, %v1256_v45 }
 0x240   :  { %v764_v52 = vmul.f32 0.015625, %v731_v11 }
 0x241   :  { %2540 = vrsqrt.f32 %v826_v8 }
 0x242   :  { %v796_v30 = vsel %vm249_vm1, %v764_v52, %v636_v49  ;;  %v1087_v25 = vpop.permute.xlu0 %1086  ;;  %v1538_v12 = vld [vmem:[#allocation3 + $0x28] sm:$0xff] }
 0x243   :  { %v828_v60 = vadd.f32 1e-05, %v796_v30  ;;  %1109 = vst.msk [vmem:[#allocation3 + $0x50] sm:$0xff] %vm1106_vm2, %v1087_v25  ;;  %v1217_v33 = vpop.permute.xlu1 %1216  ;;  %1933 = vmatmul.mubr.bf16.gmra.mrb[4].mxu0 %v1538_v12 }
 0x244   :  { %1238 = vst.msk [vmem:[#allocation3 + $0x58] sm:$0xff] %vm1106_vm2, %v1217_v33 }
 0x245   :  { %2542 = vrsqrt.f32 %v828_v60  ;;  %1270 = vst.msk [vmem:[#allocation3 + $0x58] sm:$0xff] %vm1171_vm3, %v1262_v61 }
 0x246   :  { %v1152_v58 = vpop.permute.xlu0 %1151 }
 0x247   :  { %1174 = vst.msk [vmem:[#allocation3 + $0x50] sm:$0xff] %vm1171_vm3, %v1152_v58  ;;  %v1442_v51 = vpop.permute.xlu1 %1441 }
 0x248   :  { %1463 = vst.msk [vmem:[#allocation3 + $0x68] sm:$0xff] %vm1171_vm3, %v1442_v51 }
 0x24a   :  { %v1380_v34 = vpop.permute.xlu0 %1379 }
 0x24b   :  { %v2541_v10 = vpop.eup %2540  ;;  %1400 = vst.msk [vmem:[#allocation3 + $0x90] sm:$0xff] %vm1106_vm2, %v1380_v34  ;;  %v1219_v3 = vpop.permute.xlu1 %1218 }
 0x24c   :  { %v890_v43 = vmul.f32 %v2541_v10, %v3566_v32  ;;  %1239 = vst.msk [vmem:[#allocation3 + $0x80] sm:$0xff] %vm1106_vm2, %v1219_v3  ;;  %v1544_v13 = vld [vmem:[#allocation3 + $0x58] sm:$0xff]  ;;  %v1565_v10 = vld [vmem:[#allocation3 + $0x100] sm:$0xff] }
 0x24d   :  { %1271 = vst.msk [vmem:[#allocation3 + $0x80] sm:$0xff] %vm1171_vm3, %v1263_v40  ;;  %1940 = vmatprep.mubr.bf16.mxu0 %v1544_v13 }
 0x24e   :  { %v929_v4 = vmul.f32 %v3752_v59, %v890_v43  ;;  %v1444_v26 = vpop.permute.xlu0 %1443  ;;  %v1543_v42 = vld [vmem:[#allocation3 + $0x50] sm:$0xff] }
 0x24f   :  { %v2543_v62 = vpop.eup %2542  ;;  %1464 = vst.msk [vmem:[#allocation3 + $0x90] sm:$0xff] %vm1171_vm3, %v1444_v26  ;;  %v1089_v36 = vpop.permute.xlu1 %1088  ;;  %1941 = vmatmul.mubr.bf16.gmra.mrb[8].mxu0 %v1543_v42  ;;  %v1546_v57 = vld [vmem:[#allocation3 + $0x68] sm:$0xff] }
 0x250   :  { %v968_v32 = vadd.f32 %v3760_v56, %v929_v4  ;;  %v892_v47 = vmul.f32 %v2543_v62, %v3561_v46  ;;  %1110 = vst.msk [vmem:[#allocation3 + $0x78] sm:$0xff] %vm1106_vm2, %v1089_v36  ;;  %2037 = vmatprep.mubr.bf16.mxu1 %v1546_v57 }
 0x251   :  { %2038 = vmatmul.mubr.bf16.gmra.mrb[8].mxu1 %v1545_v53 }
 0x252   :  { %1045 = vst [vmem:[#allocation2 + $0x201] sm:$0xff] %v968_v32  ;;  %v931_v5 = vmul.f32 %v3752_v59, %v892_v47  ;;  %v1221_v21 = vpop.permute.xlu0 %1220 }
 0x253   :  { %1240 = vst.msk [vmem:[#allocation3 + $0xa8] sm:$0xff] %vm1106_vm2, %v1221_v21  ;;  %v1154_v27 = vpop.permute.xlu1 %1153 }
 0x254   :  { %v970_v20 = vadd.f32 %v3760_v56, %v931_v5  ;;  %1272 = vst.msk [vmem:[#allocation3 + $0xa8] sm:$0xff] %vm1171_vm3, %v1264_v9  ;;  %1175 = vst.msk [vmem:[#allocation3 + $0x78] sm:$0xff] %vm1171_vm3, %v1154_v27  ;;  %v1549_v46 = vld [vmem:[#allocation3 + $0x80] sm:$0xff] }
 0x255   :  { %1948 = vmatprep.mubr.bf16.mxu0 %v1549_v46 }
 0x256   :  { %1047 = vst [vmem:[#allocation2 + $0x221] sm:$0xff] %v970_v20  ;;  %v1091_v19 = vpop.permute.xlu0 %1090  ;;  %v1551_v16 = vld [vmem:[#allocation3 + $0x90] sm:$0xff]  ;;  %v1299_v18 = vpack.c.bf16 %v970_v20, %v968_v32 }
 0x257   :  { %1111 = vst.msk [vmem:[#allocation3 + $0xa0] sm:$0xff] %vm1106_vm2, %v1091_v19  ;;  %v1382_v59 = vpop.permute.xlu1 %1381  ;;  %2045 = vmatprep.mubr.bf16.mxu1 %v1551_v16 }
 0x258   :  { %1401 = vst.msk [vmem:[#allocation3 + $0xb8] sm:$0xff] %vm1106_vm2, %v1382_v59  ;;  %1307 = vst.msk [vmem:[#allocation3 + $0x128] sm:$0xff] %vm1106_vm2, %v1299_v18 }
 0x259   :  { %2046 = vmatmul.mubr.bf16.gmra.mrb[12].mxu1 %v1550_v7  ;;  %1339 = vst.msk [vmem:[#allocation3 + $0x128] sm:$0xff] %vm1171_vm3, %v1299_v18  ;;  %v1258_v33 = vld [vmem:[#allocation2 + $0x200] sm:$0xff] }
 0x25a   :  { %v1156_v56 = vpop.permute.xlu0 %1155  ;;  %v3890_v7 = vld [vmem:[%s3954_s4] ss:$0 sm:$0xff]  ;;  %s2627_s4 = smov [#allocation9]  }
 0x25b   :  { %1176 = vst.msk [vmem:[#allocation3 + $0xa0] sm:$0xff] %vm1171_vm3, %v1156_v56  ;;  %v1446_v39 = vpop.permute.xlu1 %1445  ;;  %v1548_v28 = vld [vmem:[#allocation3 + $0x78] sm:$0xff]  ;;  %v1554_v41 = vld [vmem:[#allocation3 + $0xa8] sm:$0xff]  ;;  %s2204_s27 = sshll.u32 %s2627_s4, 4  ;;  %s2205_s27 = int_to_ptr.vmem [resolvable:$true] %s2204_s27 }
 0x25c   :  { %1465 = vst.msk [vmem:[#allocation3 + $0xb8] sm:$0xff] %vm1171_vm3, %v1446_v39  ;;  %1949 = vmatmul.mubr.bf16.gmra.mrb[12].mxu0 %v1548_v28  ;;  %s2592_s30 = scalar_lea.vmem %s2205_s27, 2048  ;;  %p2597_p3 = scmp.lt.s32.totalorder %s2205_s27, %s2205_s27 }
 0x25d   :  { %1956 = vmatprep.mubr.bf16.mxu0 %v1554_v41  ;;  %v1259_v12 = vld [vmem:[#allocation2 + $0x220] sm:$0xff]  ;;  %p2593_p2 = scmp.ne.s32.totalorder %s2205_s27, %s2592_s30  ;;  %p2598_p4 = scmp.lt.s32.totalorder %s2592_s30, %s2592_s30 }
 0x25e   :  { %v1384_v1 = vpop.permute.xlu0 %1383  ;;  %v1267_v58 = vpack.c.bf16 %v1259_v12, %v1258_v33 }
 0x25f   :  { %1402 = vst.msk [vmem:[#allocation3 + $0xe0] sm:$0xff] %vm1106_vm2, %v1384_v1  ;;  %v1223_v23 = vpop.permute.xlu1 %1222  ;;  %p2599_p5 = por %p2598_p4, %p2597_p3 }
 0x260   :  { %1241 = vst.msk [vmem:[#allocation3 + $0xd0] sm:$0xff] %vm1106_vm2, %v1223_v23  ;;  %v1570_v42 = vld [vmem:[#allocation3 + $0x128] sm:$0xff] }
 0x261   :  { %1273 = vst.msk [vmem:[#allocation3 + $0xd0] sm:$0xff] %vm1171_vm3, %v1265_v17  ;;  %p2600_p6 = pnand %p2599_p5, %p2593_p2 }
 0x262   :  { %v1448_v48 = vpop.permute.xlu0 %1447  ;;  %v1553_v6 = vld [vmem:[#allocation3 + $0xa0] sm:$0xff] }
 0x263   :  { %1466 = vst.msk [vmem:[#allocation3 + $0xe0] sm:$0xff] %vm1171_vm3, %v1448_v48  ;;  %v1093_v63 = vpop.permute.xlu1 %1092  ;;  %v1556_v31 = vld [vmem:[#allocation3 + $0xb8] sm:$0xff] }
 0x264   :  { %1112 = vst.msk [vmem:[#allocation3 + $0xc8] sm:$0xff] %vm1106_vm2, %v1093_v63  ;;  %1957 = vmatmul.mubr.bf16.gmra.mrb[16].mxu0 %v1553_v6  ;;  %2053 = vmatprep.mubr.bf16.mxu1 %v1556_v31 }
 0x265   :  { %2054 = vmatmul.mubr.bf16.gmra.mrb[16].mxu1 %v1555_v0 }
 0x266   :  { %v1225_v35 = vpop.permute.xlu0 %1224 }
 0x267   :  { %1242 = vst.msk [vmem:[#allocation3 + $0xf8] sm:$0xff] %vm1106_vm2, %v1225_v35  ;;  %v1158_v44 = vpop.permute.xlu1 %1157 }
 0x268   :  { %1274 = vst.msk [vmem:[#allocation3 + $0xf8] sm:$0xff] %vm1171_vm3, %v1266_v55  ;;  %1177 = vst.msk [vmem:[#allocation3 + $0xc8] sm:$0xff] %vm1171_vm3, %v1158_v44  ;;  %v1559_v14 = vld [vmem:[#allocation3 + $0xd0] sm:$0xff] }
 0x269   :  { %1964 = vmatprep.mubr.bf16.mxu0 %v1559_v14 }
 0x26a   :  { %v1095_v8 = vpop.permute.xlu0 %1094  ;;  %v1561_v11 = vld [vmem:[#allocation3 + $0xe0] sm:$0xff] }
 0x26b   :  { %1113 = vst.msk [vmem:[#allocation3 + $0xf0] sm:$0xff] %vm1106_vm2, %v1095_v8  ;;  %v1386_v52 = vpop.permute.xlu1 %1385  ;;  %2061 = vmatprep.mubr.bf16.mxu1 %v1561_v11 }
 0x26c   :  { %1403 = vst.msk [vmem:[#allocation3 + $0x108] sm:$0xff] %vm1106_vm2, %v1386_v52 }
 0x26d   :  { %2062 = vmatmul.mubr.bf16.gmra.mrb[20].mxu1 %v1560_v24 }
 0x26e   :  { %v1160_v38 = vpop.permute.xlu0 %1159 }
 0x26f   :  { %1178 = vst.msk [vmem:[#allocation3 + $0xf0] sm:$0xff] %vm1171_vm3, %v1160_v38  ;;  %v1450_v49 = vpop.permute.xlu1 %1449  ;;  %v1558_v30 = vld [vmem:[#allocation3 + $0xc8] sm:$0xff]  ;;  %v1564_v25 = vld [vmem:[#allocation3 + $0xf8] sm:$0xff] }
 0x270   :  { %1467 = vst.msk [vmem:[#allocation3 + $0x108] sm:$0xff] %vm1171_vm3, %v1450_v49  ;;  %1965 = vmatmul.mubr.bf16.gmra.mrb[20].mxu0 %v1558_v30 }
 0x271   :  { %1972 = vmatprep.mubr.bf16.mxu0 %v1564_v25 }
 0x272   :  { %v1388_v60 = vpop.permute.xlu0 %1387 }
 0x273   :  { %1404 = vst.msk [vmem:[#allocation3 + $0x130] sm:$0xff] %vm1106_vm2, %v1388_v60  ;;  %v1227_v61 = vpop.permute.xlu1 %1226 }
 0x274   :  { %1243 = vst.msk [vmem:[#allocation3 + $0x120] sm:$0xff] %vm1106_vm2, %v1227_v61 }
 0x275   :  { %1275 = vst.msk [vmem:[#allocation3 + $0x120] sm:$0xff] %vm1171_vm3, %v1267_v58 }
 0x276   :  { %v1452_v51 = vpop.permute.xlu0 %1451  ;;  %v1563_v2 = vld [vmem:[#allocation3 + $0xf0] sm:$0xff] }
 0x277   :  { %1468 = vst.msk [vmem:[#allocation3 + $0x130] sm:$0xff] %vm1171_vm3, %v1452_v51  ;;  %v1097_v54 = vpop.permute.xlu1 %1096  ;;  %v1566_v34 = vld [vmem:[#allocation3 + $0x108] sm:$0xff] }
 0x278   :  { %1114 = vst.msk [vmem:[#allocation3 + $0x118] sm:$0xff] %vm1106_vm2, %v1097_v54  ;;  %1973 = vmatmul.mubr.bf16.gmra.mrb[24].mxu0 %v1563_v2  ;;  %2069 = vmatprep.mubr.bf16.mxu1 %v1566_v34 }
 0x279   :  { %2070 = vmatmul.mubr.bf16.gmra.mrb[24].mxu1 %v1565_v10 }
 0x27a   :  { %v1502_v3 = vpop.permute.xlu0 %1501 }
 0x27b   :  { %1525 = vst.msk [vmem:[#allocation3 + $0x20] sm:$0xff] %vm1106_vm2, %v1502_v3  ;;  %v1162_v40 = vpop.permute.xlu1 %1161 }
 0x27c   :  { %1179 = vst.msk [vmem:[#allocation3 + $0x118] sm:$0xff] %vm1171_vm3, %v1162_v40  ;;  %v1569_v43 = vld [vmem:[#allocation3 + $0x120] sm:$0xff] }
 0x27d   :  { %1980 = vmatprep.mubr.bf16.mxu0 %v1569_v43 }
 0x27e   :  { %v1504_v13 = vpop.permute.xlu0 %1503  ;;  %v1571_v4 = vld [vmem:[#allocation3 + $0x130] sm:$0xff] }
 0x27f   :  { %1526 = vst.msk [vmem:[#allocation3 + $0x48] sm:$0xff] %vm1106_vm2, %v1504_v13  ;;  %v1510_v26 = vpop.permute.xlu1 %1509  ;;  %2077 = vmatprep.mubr.bf16.mxu1 %v1571_v4 }
 0x280   :  { %1529 = vst.msk [vmem:[#allocation3 + $0xc0] sm:$0xff] %vm1106_vm2, %v1510_v26 }
 0x281   :  { %2078 = vmatmul.mubr.bf16.gmra.mrb[28].mxu1 %v1570_v42 }
 0x282   :  { %v1506_v62 = vpop.permute.xlu0 %1505  ;;  %v1537_v15 = vld [vmem:[#allocation3 + $0x20] sm:$0xff] }
 0x283   :  { %1527 = vst.msk [vmem:[#allocation3 + $0x70] sm:$0xff] %vm1106_vm2, %v1506_v62  ;;  %v1512_v36 = vpop.permute.xlu1 %1511  ;;  %v1568_v57 = vld [vmem:[#allocation3 + $0x118] sm:$0xff] }
 0x284   :  { %1530 = vst.msk [vmem:[#allocation3 + $0xe8] sm:$0xff] %vm1106_vm2, %v1512_v36  ;;  %1981 = vmatmul.mubr.bf16.gmra.mrb[28].mxu0 %v1568_v57 }
 0x285   :  { %2412 = vmatprep.mubr.msk.bf16.mxu0 %vm1106_vm2, %v1537_v15 }
 0x286   :  { %v1508_v50 = vpop.permute.xlu0 %1507  ;;  %v1542_v5 = vld [vmem:[#allocation3 + $0x48] sm:$0xff] }
 0x287   :  { %1528 = vst.msk [vmem:[#allocation3 + $0x98] sm:$0xff] %vm1106_vm2, %v1508_v50  ;;  %v1514_v32 = vpop.permute.xlu1 %1513  ;;  %v1557_v47 = vld [vmem:[#allocation3 + $0xc0] sm:$0xff] }
 0x288   :  { %1531 = vst.msk [vmem:[#allocation3 + $0x110] sm:$0xff] %vm1106_vm2, %v1514_v32  ;;  %2420 = vmatprep.mubr.msk.bf16.mxu1 %vm1106_vm2, %v1557_v47 }
 0x28a   :  { %v1547_v21 = vld [vmem:[#allocation3 + $0x70] sm:$0xff] }
 0x28b   :  { %v1516_v53 = vpop.permute.xlu1 %1515  ;;  %v1562_v9 = vld [vmem:[#allocation3 + $0xe8] sm:$0xff] }
 0x28c   :  { %1532 = vst.msk [vmem:[#allocation3 + $0x138] sm:$0xff] %vm1106_vm2, %v1516_v53  ;;  %2413 = vmatmul.mubr.msk.bf16.vlgmr.msra.gmra.mrb[32].mxu0 %vm1106_vm2, %v1542_v5  ;;  %2421 = vmatmul.mubr.msk.bf16.vlgmr.msra.gmra.mrb[32].mxu1 %vm1106_vm2, %v1562_v9 }
 0x28d   :  { %2416 = vmatprep.mubr.msk.bf16.mxu0 %vm1106_vm2, %v1547_v21 }
 0x28e   :  { %v1552_v20 = vld [vmem:[#allocation3 + $0x98] sm:$0xff] }
 0x28f   :  { %v1567_v27 = vld [vmem:[#allocation3 + $0x110] sm:$0xff] }
 0x290   :  { %2424 = vmatprep.mubr.msk.bf16.mxu1 %vm1106_vm2, %v1567_v27 }
 0x293   :  { %v1572_v46 = vld [vmem:[#allocation3 + $0x138] sm:$0xff] }
 0x294   :  { %2417 = vmatmul.mubr.msk.bf16.gmra.mrb[36].mxu0 %vm1106_vm2, %v1552_v20  ;;  %2425 = vmatmul.mubr.msk.bf16.gmra.mrb[36].mxu1 %vm1106_vm2, %v1572_v46 }
 0x2cd   :  { %v2280_v19 = vpop.f32.mrb[0].mxu0 }
 0x2ce   :  { %v2281_v16 = vpop.f32.mrb[1].mxu0 }
 0x2cf   :  { %v2282_v18 = vadd.f32 %v2281_v16, %v2280_v19  ;;  %v2283_v59 = vpop.f32.mrb[2].mxu0 }
 0x2d0   :  { %v2284_v56 = vpop.f32.mrb[3].mxu0 }
 0x2d1   :  { %v2285_v39 = vadd.f32 %v2284_v56, %v2283_v59  ;;  %v2344_v28 = vpop.f32.mrb[0].mxu1  ;;  %v1927_v29 = vadd.f32 %v2282_v18, %v3890_v7 }
 0x2d2   :  { %v2345_v41 = vpop.f32.mrb[1].mxu1 }
 0x2d3   :  { %v2346_v37 = vadd.f32 %v2345_v41, %v2344_v28  ;;  %v2347_v1 = vpop.f32.mrb[2].mxu1  ;;  %v1930_v17 = vadd.f32 %v2285_v39, %v3890_v7 }
 0x2d4   :  { %v2348_v23 = vpop.f32.mrb[3].mxu1 }
 0x2d5   :  { %v2349_v48 = vadd.f32 %v2348_v23, %v2347_v1  ;;  %v3894_v6 = vadd.f32 %v2346_v37, %v1927_v29 }
 0x2d7   :  { %v3896_v63 = vadd.f32 %v2349_v48, %v1930_v17 }
 0x2d9   :  { %v2350_v31 = vpop.f32.mrb[4].mxu1 }
 0x2da   :  { %v2351_v22 = vpop.f32.mrb[5].mxu1 }
 0x2db   :  { %v2352_v0 = vadd.f32 %v2351_v22, %v2350_v31  ;;  %v2353_v45 = vpop.f32.mrb[6].mxu1 }
 0x2dc   :  { %v2354_v55 = vpop.f32.mrb[7].mxu1 }
 0x2dd   :  { %v2355_v35 = vadd.f32 %v2354_v55, %v2353_v45 }
 0x316   :  { %v2286_v44 = vpop.f32.mrb[4].mxu0 }
 0x317   :  { %v2287_v14 = vpop.f32.mrb[5].mxu0 }
 0x318   :  { %v2288_v8 = vadd.f32 %v2287_v14, %v2286_v44  ;;  %v2289_v11 = vpop.f32.mrb[6].mxu0 }
 0x319   :  { %v2290_v52 = vpop.f32.mrb[7].mxu0 }
 0x31a   :  { %v1935_v24 = vadd.f32 %v2288_v8, %v3890_v7  ;;  %v2291_v38 = vadd.f32 %v2290_v52, %v2289_v11 }
 0x31c   :  { %v1938_v49 = vadd.f32 %v2291_v38, %v3890_v7  ;;  %v3900_v30 = vadd.f32 %v2352_v0, %v1935_v24 }
 0x31e   :  { %v3902_v25 = vadd.f32 %v2355_v35, %v1938_v49 }
 0x322   :  { %v2292_v12 = vpop.f32.mrb[8].mxu0 }
 0x323   :  { %v2293_v60 = vpop.f32.mrb[9].mxu0 }
 0x324   :  { %v2294_v33 = vadd.f32 %v2293_v60, %v2292_v12  ;;  %v2295_v61 = vpop.f32.mrb[10].mxu0  ;;  %v2356_v58 = vpop.f32.mrb[8].mxu1 }
 0x325   :  { %v2296_v51 = vpop.f32.mrb[11].mxu0  ;;  %v2357_v2 = vpop.f32.mrb[9].mxu1 }
 0x326   :  { %v1943_v54 = vadd.f32 %v2294_v33, %v3890_v7  ;;  %v2297_v34 = vadd.f32 %v2296_v51, %v2295_v61  ;;  %v2358_v10 = vadd.f32 %v2357_v2, %v2356_v58  ;;  %v2359_v3 = vpop.f32.mrb[10].mxu1 }
 0x327   :  { %v2360_v40 = vpop.f32.mrb[11].mxu1 }
 0x328   :  { %v1946_v43 = vadd.f32 %v2297_v34, %v3890_v7  ;;  %v2361_v13 = vadd.f32 %v2360_v40, %v2359_v3  ;;  %v3906_v4 = vadd.f32 %v2358_v10, %v1943_v54 }
 0x32a   :  { %v3908_v26 = vadd.f32 %v2361_v13, %v1946_v43 }
 0x32c   :  { %v2362_v42 = vpop.f32.mrb[12].mxu1 }
 0x32d   :  { %v2363_v62 = vpop.f32.mrb[13].mxu1 }
 0x32e   :  { %v2364_v36 = vadd.f32 %v2363_v62, %v2362_v42  ;;  %v2365_v57 = vpop.f32.mrb[14].mxu1 }
 0x32f   :  { %v2298_v15 = vpop.f32.mrb[12].mxu0  ;;  %v2366_v50 = vpop.f32.mrb[15].mxu1 }
 0x330   :  { %v2367_v32 = vadd.f32 %v2366_v50, %v2365_v57  ;;  %v2299_v47 = vpop.f32.mrb[13].mxu0 }
 0x331   :  { %v2300_v53 = vadd.f32 %v2299_v47, %v2298_v15  ;;  %v2301_v5 = vpop.f32.mrb[14].mxu0 }
 0x332   :  { %v2302_v9 = vpop.f32.mrb[15].mxu0 }
 0x333   :  { %v1951_v21 = vadd.f32 %v2300_v53, %v3890_v7  ;;  %v2303_v27 = vadd.f32 %v2302_v9, %v2301_v5 }
 0x335   :  { %v1954_v20 = vadd.f32 %v2303_v27, %v3890_v7  ;;  %v3912_v46 = vadd.f32 %v2364_v36, %v1951_v21 }
 0x337   :  { %v2304_v19 = vpop.f32.mrb[16].mxu0  ;;  %v3914_v16 = vadd.f32 %v2367_v32, %v1954_v20 }
 0x338   :  { %v2305_v18 = vpop.f32.mrb[17].mxu0  ;;  %v2368_v59 = vpop.f32.mrb[16].mxu1 }
 0x339   :  { %v2306_v56 = vadd.f32 %v2305_v18, %v2304_v19  ;;  %v2307_v39 = vpop.f32.mrb[18].mxu0  ;;  %v2369_v28 = vpop.f32.mrb[17].mxu1 }
 0x33a   :  { %v2370_v41 = vadd.f32 %v2369_v28, %v2368_v59  ;;  %v2308_v29 = vpop.f32.mrb[19].mxu0  ;;  %v2371_v37 = vpop.f32.mrb[18].mxu1 }
 0x33b   :  { %v1959_v1 = vadd.f32 %v2306_v56, %v3890_v7  ;;  %v2309_v23 = vadd.f32 %v2308_v29, %v2307_v39  ;;  %v2372_v17 = vpop.f32.mrb[19].mxu1 }
 0x33c   :  { %v2373_v48 = vadd.f32 %v2372_v17, %v2371_v37 }
 0x33d   :  { %v1962_v31 = vadd.f32 %v2309_v23, %v3890_v7  ;;  %v2056_v22 = vadd.f32 %v2370_v41, %v1959_v1 }
 0x33f   :  { %v3918_v0 = vadd.f32 %v2373_v48, %v1962_v31 }
 0x340   :  { %v2374_v45 = vpop.f32.mrb[20].mxu1 }
 0x341   :  { %v2375_v55 = vpop.f32.mrb[21].mxu1 }
 0x342   :  { %v2376_v35 = vadd.f32 %v2375_v55, %v2374_v45  ;;  %v2377_v44 = vpop.f32.mrb[22].mxu1 }
 0x343   :  { %v2310_v14 = vpop.f32.mrb[20].mxu0  ;;  %v2378_v8 = vpop.f32.mrb[23].mxu1 }
 0x344   :  { %v2379_v11 = vadd.f32 %v2378_v8, %v2377_v44  ;;  %v2311_v52 = vpop.f32.mrb[21].mxu0 }
 0x345   :  { %v2312_v24 = vadd.f32 %v2311_v52, %v2310_v14  ;;  %v2313_v38 = vpop.f32.mrb[22].mxu0 }
 0x346   :  { %v2314_v49 = vpop.f32.mrb[23].mxu0 }
 0x347   :  { %v1967_v12 = vadd.f32 %v2312_v24, %v3890_v7  ;;  %v2315_v60 = vadd.f32 %v2314_v49, %v2313_v38 }
 0x349   :  { %v1970_v33 = vadd.f32 %v2315_v60, %v3890_v7  ;;  %v2064_v61 = vadd.f32 %v2376_v35, %v1967_v12 }
 0x34b   :  { %v2316_v58 = vpop.f32.mrb[24].mxu0  ;;  %v2067_v51 = vadd.f32 %v2379_v11, %v1970_v33 }
 0x34c   :  { %v2317_v2 = vpop.f32.mrb[25].mxu0  ;;  %v2380_v54 = vpop.f32.mrb[24].mxu1 }
 0x34d   :  { %v2318_v34 = vadd.f32 %v2317_v2, %v2316_v58  ;;  %v2319_v10 = vpop.f32.mrb[26].mxu0  ;;  %v2381_v3 = vpop.f32.mrb[25].mxu1 }
 0x34e   :  { %v2382_v40 = vadd.f32 %v2381_v3, %v2380_v54  ;;  %v2320_v43 = vpop.f32.mrb[27].mxu0  ;;  %v2383_v13 = vpop.f32.mrb[26].mxu1 }
 0x34f   :  { %v1975_v42 = vadd.f32 %v2318_v34, %v3890_v7  ;;  %v2321_v62 = vadd.f32 %v2320_v43, %v2319_v10  ;;  %v2384_v36 = vpop.f32.mrb[27].mxu1 }
 0x350   :  { %v2385_v57 = vadd.f32 %v2384_v36, %v2383_v13 }
 0x351   :  { %v1978_v15 = vadd.f32 %v2321_v62, %v3890_v7  ;;  %v2072_v50 = vadd.f32 %v2382_v40, %v1975_v42 }
 0x353   :  { %v2075_v32 = vadd.f32 %v2385_v57, %v1978_v15 }
 0x354   :  { %v2386_v47 = vpop.f32.mrb[28].mxu1 }
 0x355   :  { %v2387_v53 = vpop.f32.mrb[29].mxu1 }
 0x356   :  { %v2388_v5 = vadd.f32 %v2387_v53, %v2386_v47  ;;  %v2389_v9 = vpop.f32.mrb[30].mxu1 }
 0x357   :  { %v2322_v21 = vpop.f32.mrb[28].mxu0  ;;  %v2390_v27 = vpop.f32.mrb[31].mxu1 }
 0x358   :  { %v2391_v20 = vadd.f32 %v2390_v27, %v2389_v9  ;;  %v2323_v19 = vpop.f32.mrb[29].mxu0 }
 0x359   :  { %v2324_v18 = vadd.f32 %v2323_v19, %v2322_v21  ;;  %v2325_v59 = vpop.f32.mrb[30].mxu0 }
 0x35a   :  { %v2326_v56 = vpop.f32.mrb[31].mxu0 }
 0x35b   :  { %v1983_v39 = vadd.f32 %v2324_v18, %v3890_v7  ;;  %v2327_v28 = vadd.f32 %v2326_v56, %v2325_v59 }
 0x35d   :  { %v1986_v41 = vadd.f32 %v2327_v28, %v3890_v7  ;;  %v2080_v29 = vadd.f32 %v2388_v5, %v1983_v39 }
 0x35f   :  { %v2414_v37 = vpop.f32.mrb[32].mxu0  ;;  %v2422_v1 = vpop.f32.mrb[32].mxu1  ;;  %v2083_v23 = vadd.f32 %v2391_v20, %v1986_v41 }
 0x360   :  { %v2129_v17 = vadd.f32 %v2414_v37, %v3900_v30  ;;  %v2161_v48 = vadd.f32 %v2422_v1, %v2064_v61  ;;  %v2120_v31 = vpop.f32.mrb[33].mxu0  ;;  %v2152_v45 = vpop.f32.mrb[33].mxu1 }
 0x361   :  { %v2121_v55 = vadd.f32 %v2120_v31, %v3894_v6  ;;  %v2153_v35 = vadd.f32 %v2152_v45, %v2056_v22  ;;  %v2415_v44 = vpop.f32.mrb[34].mxu0  ;;  %v2423_v14 = vpop.f32.mrb[34].mxu1 }
 0x362   :  { %2185 = vst [vmem:[#allocation9 + $0x10] sm:$0xff] %v2129_v17  ;;  %2193 = vst [vmem:[#allocation9 + $0x50] sm:$0xff] %v2161_v48  ;;  %v2132_v8 = vadd.f32 %v2415_v44, %v3902_v25  ;;  %v2164_v11 = vadd.f32 %v2423_v14, %v2067_v51  ;;  %v2123_v7 = vpop.f32.mrb[35].mxu0  ;;  %v2155_v52 = vpop.f32.mrb[35].mxu1 }
 0x363   :  { %2183 = vst [vmem:[#allocation9] sm:$0xff] %v2121_v55  ;;  %2191 = vst [vmem:[#allocation9 + $0x40] sm:$0xff] %v2153_v35  ;;  %v2124_v24 = vadd.f32 %v2123_v7, %v3896_v63  ;;  %v2156_v30 = vadd.f32 %v2155_v52, %v3918_v0 }
 0x364   :  { %2186 = vst [vmem:[#allocation9 + $0x18] sm:$0xff] %v2132_v8  ;;  %2194 = vst [vmem:[#allocation9 + $0x58] sm:$0xff] %v2164_v11 }
 0x365   :  { %2184 = vst [vmem:[#allocation9 + $0x8] sm:$0xff] %v2124_v24  ;;  %2192 = vst [vmem:[#allocation9 + $0x48] sm:$0xff] %v2156_v30 }
 0x367   :  { %v2418_v6 = vpop.f32.mrb[36].mxu0  ;;  %v2426_v22 = vpop.f32.mrb[36].mxu1 }
 0x368   :  { %v2145_v38 = vadd.f32 %v2418_v6, %v3912_v46  ;;  %v2177_v49 = vadd.f32 %v2426_v22, %v2080_v29  ;;  %v2136_v12 = vpop.f32.mrb[37].mxu0  ;;  %v2168_v25 = vpop.f32.mrb[37].mxu1 }
 0x369   :  { %v2137_v60 = vadd.f32 %v2136_v12, %v3906_v4  ;;  %v2169_v33 = vadd.f32 %v2168_v25, %v2072_v50  ;;  %v2419_v61 = vpop.f32.mrb[38].mxu0  ;;  %v2427_v63 = vpop.f32.mrb[38].mxu1 }
 0x36a   :  { %2189 = vst [vmem:[#allocation9 + $0x30] sm:$0xff] %v2145_v38  ;;  %2197 = vst [vmem:[#allocation9 + $0x70] sm:$0xff] %v2177_v49  ;;  %v2148_v0 = vadd.f32 %v2419_v61, %v3914_v16  ;;  %v2180_v58 = vadd.f32 %v2427_v63, %v2083_v23  ;;  %v2139_v51 = vpop.f32.mrb[39].mxu0  ;;  %v2171_v2 = vpop.f32.mrb[39].mxu1 }
 0x36b   :  { %2187 = vst [vmem:[#allocation9 + $0x20] sm:$0xff] %v2137_v60  ;;  %2195 = vst [vmem:[#allocation9 + $0x60] sm:$0xff] %v2169_v33  ;;  %v2140_v46 = vadd.f32 %v2139_v51, %v3908_v26  ;;  %v2172_v54 = vadd.f32 %v2171_v2, %v2075_v32 }
 0x36c   :  { %2190 = vst [vmem:[#allocation9 + $0x38] sm:$0xff] %v2148_v0  ;;  %2198 = vst [vmem:[#allocation9 + $0x78] sm:$0xff] %v2180_v58 }
 0x36d   :  { %2188 = vst [vmem:[#allocation9 + $0x28] sm:$0xff] %v2140_v46  ;;  %2196 = vst [vmem:[#allocation9 + $0x68] sm:$0xff] %v2172_v54 }
 0x36e   :  { %2603 = shalt.err (!%p2600_p6)
}
 0x36f   :  { %s2604_s8 = scalar_lea.hbm %s3955_s5, 2048 }
 0x370   :  { %p2605_p7 = scmp.ne.s32.totalorder %s3955_s5, %s2604_s8  ;;  %p2608_p8 = scmp.lt.u32.totalorder %s2604_s8, %s3955_s5 }
 0x372   :  { %p2610_p9 = pnand %p2608_p8, %p2605_p7 }
 0x374   :  { %2613 = shalt.err (!%p2610_p9)
}
 0x375   :  { %2210 = dma.vmem_to_hbm [thread:$0]  %s2205_s27, 2048, %s3955_s5, [#allocation6], %s2621_s28, %s2621_s28, %s2622_s29  }
 0x376   :  { %2618 = dma.done.wait [#allocation6], 2048  }
 0x377   :  { %2619 = vsyncadd [#allocation6], 4294965248 }
 0x378   :  { %2214 = vsyncpa [#allocation5], 1 }
 0x379   :  { %2215 = vsyncpa [#allocation8], 1 }
 0x37a   :  { %2216 = vsyncpa [#allocation6], 1 }

</bundles_post_ra>
